<compile_context>
chip_gen: v7x
topology: tpu7x:2x2x1
jax: 0.10.0
libtpu: 0.0.40
codegen_flags: <defaults>
</compile_context>

<pallas_src>
import functools

import jax
import jax.numpy as jnp
import numpy as np
from jax.experimental import pallas as pl
from jax.experimental.pallas import tpu as pltpu


def _convt_bn_kernel(x_ref, w_ref, gamma_ref, beta_ref, out_ref, xp_ref,
                     *, N, Cin, Cout, Cout_pad, H, W, K, eps):
    # x_ref:     (N, Cin, H, W)        VMEM, unpadded input
    # w_ref:     (Cout*Cin*K*K,)       SMEM, spatially flipped / channel-swapped weights
    # gamma_ref: (Cout_pad, 1)         VMEM, BN scale (zero-padded rows)
    # beta_ref:  (Cout_pad, 1)         VMEM, BN shift (zero-padded rows)
    # out_ref:   (Cout_pad, N*OH*OW)   VMEM, lane-major normalized output
    # xp_ref:    (Cin, HP, WP)         VMEM scratch, zero-padded image
    OH, OW = H + K - 1, W + K - 1
    P = K - 1
    L = N * OH * OW

    # Zero the padded scratch once; the halo stays zero across samples.
    xp_ref[...] = jnp.zeros_like(xp_ref)

    slabs = []
    for n in range(N):                                   # static, tiny
        xp_ref[:, P:P + H, P:P + W] = x_ref[n]           # interior write only

        # 2-D windows of the padded image, loaded once and reused across Cout.
        wins = []
        for ci in range(Cin):
            for kh in range(K):
                for kw in range(K):
                    wins.append(xp_ref[ci, kh:kh + OH, kw:kw + OW])   # (OH, OW)

        # Transposed conv = sum of (SMEM scalar weight) * (window): pure VPU FMAs,
        # no MXU, no per-window flatten/relayout.
        chans = []
        for co in range(Cout):
            acc = jnp.zeros((OH, OW), jnp.float32)
            t = 0
            for ci in range(Cin):
                for kh in range(K):
                    for kw in range(K):
                        wscal = w_ref[(co * Cin + ci) * K * K + kh * K + kw]
                        acc = acc + wscal * wins[t]
                        t += 1
            chans.append(acc)
        for _ in range(Cout, Cout_pad):                  # explicit sublane padding
            chans.append(jnp.zeros((OH, OW), jnp.float32))

        # One relayout per sample: (Cout_pad, OH, OW) -> (Cout_pad, OH*OW).
        slabs.append(jnp.stack(chans, axis=0).reshape(Cout_pad, OH * OW))

    o = slabs[0] if N == 1 else jnp.concatenate(slabs, axis=1)   # (Cout_pad, L)

    # BatchNorm2d, training mode: per-channel batch stats over (N, H, W),
    # biased variance, computed in one pass (sum / sum-of-squares).
    inv_l = 1.0 / float(L)
    s1 = jnp.sum(o, axis=1, keepdims=True)
    s2 = jnp.sum(o * o, axis=1, keepdims=True)
    mean = s1 * inv_l
    var = s2 * inv_l - mean * mean
    y = (o - mean) * jax.lax.rsqrt(var + eps)
    out_ref[...] = y * gamma_ref[...] + beta_ref[...]


def conv_transpose_bn(x, w, b, gamma, beta, eps=1e-5):
    """x: (N, Cin, H, W); w: (Cin, Cout, K, K) (PyTorch ConvTranspose2d layout).

    `b` (conv-transpose bias) is accepted for API parity but unused: a
    per-channel constant added before training-mode BatchNorm cancels exactly.
    """
    del b
    N, Cin, H, W = x.shape
    _, Cout, K, _ = w.shape
    OH, OW = H + K - 1, W + K - 1
    P = K - 1
    HP, WP = H + 2 * P, W + 2 * P
    L = N * OH * OW
    Cout_pad = ((Cout + 7) // 8) * 8

    # Flip the kernel spatially and swap in/out channel axes so the transposed
    # conv becomes a plain correlation on a zero-padded input; flatten so the
    # kernel can read individual weights as SMEM scalars.
    wf = jnp.transpose(w[:, :, ::-1, ::-1], (1, 0, 2, 3)).reshape(-1)
    wf = wf.astype(jnp.float32)
    g2 = jnp.zeros((Cout_pad, 1), jnp.float32).at[:Cout, 0].set(gamma.astype(jnp.float32))
    be2 = jnp.zeros((Cout_pad, 1), jnp.float32).at[:Cout, 0].set(beta.astype(jnp.float32))

    kernel = functools.partial(
        _convt_bn_kernel, N=N, Cin=Cin, Cout=Cout, Cout_pad=Cout_pad,
        H=H, W=W, K=K, eps=eps)

    y2d = pl.pallas_call(
        kernel,
        out_shape=jax.ShapeDtypeStruct((Cout_pad, L), jnp.float32),
        in_specs=[
            pl.BlockSpec(memory_space=pltpu.MemorySpace.VMEM),   # x (whole array)
            pl.BlockSpec(memory_space=pltpu.MemorySpace.SMEM),   # weights (scalar reads)
            pl.BlockSpec(memory_space=pltpu.MemorySpace.VMEM),   # gamma (Cout_pad, 1)
            pl.BlockSpec(memory_space=pltpu.MemorySpace.VMEM),   # beta  (Cout_pad, 1)
        ],
        out_specs=pl.BlockSpec(memory_space=pltpu.MemorySpace.VMEM),
        scratch_shapes=[pltpu.VMEM((Cin, HP, WP), jnp.float32)],
        # TODO(synk): if generalized to large N/H/W, add a grid over the flattened
        # N*OH*OW lane axis (marked "parallel") with per-generation tile sizes
        # (v7x: 64 MiB VMEM, 2 TCs) and raise vmem_limit_bytes as needed.
    )(x.astype(jnp.float32), wf, g2, be2)

    # Lane-major (Cout_pad, N*OH*OW) -> (N, Cout, OH, OW) in plain XLA.
    y = y2d[:Cout].reshape(Cout, N, OH, OW)
    return jnp.transpose(y, (1, 0, 2, 3))


def _reference(x, w, b, gamma, beta, eps=1e-5):
    """Pure-JAX reference: direct scatter-add form of ConvTranspose2d + BN."""
    N, Cin, H, W = x.shape
    _, Cout, K, _ = w.shape
    OH, OW = H + K - 1, W + K - 1
    o = jnp.zeros((N, Cout, OH, OW), jnp.float32)
    for kh in range(K):
        for kw in range(K):
            o = o.at[:, :, kh:kh + H, kw:kw + W].add(
                jnp.einsum('io,nihw->nohw', w[:, :, kh, kw], x))
    o = o + b[None, :, None, None]
    mean = jnp.mean(o, axis=(0, 2, 3), keepdims=True)
    var = jnp.mean((o - mean) ** 2, axis=(0, 2, 3), keepdims=True)
    y = (o - mean) * jax.lax.rsqrt(var + eps)
    return y * gamma[None, :, None, None] + beta[None, :, None, None]


if __name__ == "__main__":
    key = jax.random.PRNGKey(0)
    kx, kw, kb = jax.random.split(key, 3)

    # Shapes implied by the module: x4 = (1, 2, 4, 4); ConvTranspose2d(2, 5, 3).
    N, Cin, H, W = 1, 2, 4, 4
    Cout, K = 5, 3

    x = jax.random.normal(kx, (N, Cin, H, W), jnp.float32)
    # Deterministic synthetic parameters (PyTorch layout: (Cin, Cout, K, K)).
    fan = Cin * K * K
    bound = 1.0 / np.sqrt(fan)
    w = jax.random.uniform(kw, (Cin, Cout, K, K), jnp.float32, -bound, bound)
    b = jax.random.uniform(kb, (Cout,), jnp.float32, -bound, bound)
    gamma = jnp.ones((Cout,), jnp.float32)
    beta = jnp.zeros((Cout,), jnp.float32)

    out = conv_transpose_bn(x, w, b, gamma, beta)
    out = jax.block_until_ready(out)

    ref = jax.block_until_ready(_reference(x, w, b, gamma, beta))
    assert out.shape == (N, Cout, H + K - 1, W + K - 1)
    np.testing.assert_allclose(np.asarray(out), np.asarray(ref), rtol=1e-4, atol=1e-4)

    print("KERNEL_OK")
</pallas_src>

<mosaic_0001>
module attributes {stable_mosaic.version = 11 : i64} {
  func.func @_convt_bn_kernel(%arg0: memref<1x2x4x4xf32, #tpu.memory_space<vmem>>, %arg1: memref<90xf32, #tpu.memory_space<smem>>, %arg2: memref<8x1xf32, #tpu.memory_space<vmem>>, %arg3: memref<8x1xf32, #tpu.memory_space<vmem>>, %arg4: memref<8x36xf32, #tpu.memory_space<vmem>>, %arg5: memref<2x8x8xf32, #tpu.memory_space<vmem>>) attributes {dimension_semantics = [], scalar_prefetch = 0 : i64, scratch_operands = 1 : i64, tpu.core_type = #tpu.core_type<tc>} {
    %cst = arith.constant 0.000000e+00 : f32
    %0 = vector.broadcast %cst : f32 to vector<2x8x8xf32>
    %c0 = arith.constant 0 : index
    %c0_0 = arith.constant 0 : index
    %c0_1 = arith.constant 0 : index
    %1 = vector.load %arg5[%c0, %c0_0, %c0_1] : memref<2x8x8xf32, #tpu.memory_space<vmem>>, vector<2x8x8xf32>
    tpu.vector_store %arg5[%c0, %c0_0, %c0_1], %0 {strides = array<i32>} : memref<2x8x8xf32, #tpu.memory_space<vmem>>, vector<2x8x8xf32>,
    %c0_2 = arith.constant 0 : index
    %c0_3 = arith.constant 0 : index
    %c0_4 = arith.constant 0 : index
    %c0_5 = arith.constant 0 : index
    %2 = vector.load %arg0[%c0_2, %c0_3, %c0_4, %c0_5] : memref<1x2x4x4xf32, #tpu.memory_space<vmem>>, vector<1x2x4x4xf32>
    %3 = vector.shape_cast %2 : vector<1x2x4x4xf32> to vector<2x4x4xf32>
    %c0_6 = arith.constant 0 : index
    %c2 = arith.constant 2 : index
    %c2_7 = arith.constant 2 : index
    %4 = vector.load %arg5[%c0_6, %c2, %c2_7] : memref<2x8x8xf32, #tpu.memory_space<vmem>>, vector<2x4x4xf32>
    tpu.vector_store %arg5[%c0_6, %c2, %c2_7], %3 {strides = array<i32>} : memref<2x8x8xf32, #tpu.memory_space<vmem>>, vector<2x4x4xf32>,
    %c0_8 = arith.constant 0 : index
    %c0_9 = arith.constant 0 : index
    %c0_10 = arith.constant 0 : index
    %5 = vector.load %arg5[%c0_8, %c0_9, %c0_10] : memref<2x8x8xf32, #tpu.memory_space<vmem>>, vector<1x6x6xf32>
    %6 = vector.shape_cast %5 : vector<1x6x6xf32> to vector<6x6xf32>
    %c0_11 = arith.constant 0 : index
    %c0_12 = arith.constant 0 : index
    %c1 = arith.constant 1 : index
    %7 = vector.load %arg5[%c0_11, %c0_12, %c1] : memref<2x8x8xf32, #tpu.memory_space<vmem>>, vector<1x6x6xf32>
    %8 = vector.shape_cast %7 : vector<1x6x6xf32> to vector<6x6xf32>
    %c0_13 = arith.constant 0 : index
    %c0_14 = arith.constant 0 : index
    %c2_15 = arith.constant 2 : index
    %9 = vector.load %arg5[%c0_13, %c0_14, %c2_15] : memref<2x8x8xf32, #tpu.memory_space<vmem>>, vector<1x6x6xf32>
    %10 = vector.shape_cast %9 : vector<1x6x6xf32> to vector<6x6xf32>
    %c0_16 = arith.constant 0 : index
    %c1_17 = arith.constant 1 : index
    %c0_18 = arith.constant 0 : index
    %11 = vector.load %arg5[%c0_16, %c1_17, %c0_18] : memref<2x8x8xf32, #tpu.memory_space<vmem>>, vector<1x6x6xf32>
    %12 = vector.shape_cast %11 : vector<1x6x6xf32> to vector<6x6xf32>
    %c0_19 = arith.constant 0 : index
    %c1_20 = arith.constant 1 : index
    %c1_21 = arith.constant 1 : index
    %13 = vector.load %arg5[%c0_19, %c1_20, %c1_21] : memref<2x8x8xf32, #tpu.memory_space<vmem>>, vector<1x6x6xf32>
    %14 = vector.shape_cast %13 : vector<1x6x6xf32> to vector<6x6xf32>
    %c0_22 = arith.constant 0 : index
    %c1_23 = arith.constant 1 : index
    %c2_24 = arith.constant 2 : index
    %15 = vector.load %arg5[%c0_22, %c1_23, %c2_24] : memref<2x8x8xf32, #tpu.memory_space<vmem>>, vector<1x6x6xf32>
    %16 = vector.shape_cast %15 : vector<1x6x6xf32> to vector<6x6xf32>
    %c0_25 = arith.constant 0 : index
    %c2_26 = arith.constant 2 : index
    %c0_27 = arith.constant 0 : index
    %17 = vector.load %arg5[%c0_25, %c2_26, %c0_27] : memref<2x8x8xf32, #tpu.memory_space<vmem>>, vector<1x6x6xf32>
    %18 = vector.shape_cast %17 : vector<1x6x6xf32> to vector<6x6xf32>
    %c0_28 = arith.constant 0 : index
    %c2_29 = arith.constant 2 : index
    %c1_30 = arith.constant 1 : index
    %19 = vector.load %arg5[%c0_28, %c2_29, %c1_30] : memref<2x8x8xf32, #tpu.memory_space<vmem>>, vector<1x6x6xf32>
    %20 = vector.shape_cast %19 : vector<1x6x6xf32> to vector<6x6xf32>
    %c0_31 = arith.constant 0 : index
    %c2_32 = arith.constant 2 : index
    %c2_33 = arith.constant 2 : index
    %21 = vector.load %arg5[%c0_31, %c2_32, %c2_33] : memref<2x8x8xf32, #tpu.memory_space<vmem>>, vector<1x6x6xf32>
    %22 = vector.shape_cast %21 : vector<1x6x6xf32> to vector<6x6xf32>
    %c1_34 = arith.constant 1 : index
    %c0_35 = arith.constant 0 : index
    %c0_36 = arith.constant 0 : index
    %23 = vector.load %arg5[%c1_34, %c0_35, %c0_36] : memref<2x8x8xf32, #tpu.memory_space<vmem>>, vector<1x6x6xf32>
    %24 = vector.shape_cast %23 : vector<1x6x6xf32> to vector<6x6xf32>
    %c1_37 = arith.constant 1 : index
    %c0_38 = arith.constant 0 : index
    %c1_39 = arith.constant 1 : index
    %25 = vector.load %arg5[%c1_37, %c0_38, %c1_39] : memref<2x8x8xf32, #tpu.memory_space<vmem>>, vector<1x6x6xf32>
    %26 = vector.shape_cast %25 : vector<1x6x6xf32> to vector<6x6xf32>
    %c1_40 = arith.constant 1 : index
    %c0_41 = arith.constant 0 : index
    %c2_42 = arith.constant 2 : index
    %27 = vector.load %arg5[%c1_40, %c0_41, %c2_42] : memref<2x8x8xf32, #tpu.memory_space<vmem>>, vector<1x6x6xf32>
    %28 = vector.shape_cast %27 : vector<1x6x6xf32> to vector<6x6xf32>
    %c1_43 = arith.constant 1 : index
    %c1_44 = arith.constant 1 : index
    %c0_45 = arith.constant 0 : index
    %29 = vector.load %arg5[%c1_43, %c1_44, %c0_45] : memref<2x8x8xf32, #tpu.memory_space<vmem>>, vector<1x6x6xf32>
    %30 = vector.shape_cast %29 : vector<1x6x6xf32> to vector<6x6xf32>
    %c1_46 = arith.constant 1 : index
    %c1_47 = arith.constant 1 : index
    %c1_48 = arith.constant 1 : index
    %31 = vector.load %arg5[%c1_46, %c1_47, %c1_48] : memref<2x8x8xf32, #tpu.memory_space<vmem>>, vector<1x6x6xf32>
    %32 = vector.shape_cast %31 : vector<1x6x6xf32> to vector<6x6xf32>
    %c1_49 = arith.constant 1 : index
    %c1_50 = arith.constant 1 : index
    %c2_51 = arith.constant 2 : index
    %33 = vector.load %arg5[%c1_49, %c1_50, %c2_51] : memref<2x8x8xf32, #tpu.memory_space<vmem>>, vector<1x6x6xf32>
    %34 = vector.shape_cast %33 : vector<1x6x6xf32> to vector<6x6xf32>
    %c1_52 = arith.constant 1 : index
    %c2_53 = arith.constant 2 : index
    %c0_54 = arith.constant 0 : index
    %35 = vector.load %arg5[%c1_52, %c2_53, %c0_54] : memref<2x8x8xf32, #tpu.memory_space<vmem>>, vector<1x6x6xf32>
    %36 = vector.shape_cast %35 : vector<1x6x6xf32> to vector<6x6xf32>
    %c1_55 = arith.constant 1 : index
    %c2_56 = arith.constant 2 : index
    %c1_57 = arith.constant 1 : index
    %37 = vector.load %arg5[%c1_55, %c2_56, %c1_57] : memref<2x8x8xf32, #tpu.memory_space<vmem>>, vector<1x6x6xf32>
    %38 = vector.shape_cast %37 : vector<1x6x6xf32> to vector<6x6xf32>
    %c1_58 = arith.constant 1 : index
    %c2_59 = arith.constant 2 : index
    %c2_60 = arith.constant 2 : index
    %39 = vector.load %arg5[%c1_58, %c2_59, %c2_60] : memref<2x8x8xf32, #tpu.memory_space<vmem>>, vector<1x6x6xf32>
    %40 = vector.shape_cast %39 : vector<1x6x6xf32> to vector<6x6xf32>
    %cst_61 = arith.constant 0.000000e+00 : f32
    %41 = vector.broadcast %cst_61 : f32 to vector<6x6xf32>
    %c0_62 = arith.constant 0 : index
    %42 = memref.load %arg1[%c0_62] : memref<90xf32, #tpu.memory_space<smem>>
    %43 = vector.broadcast %42 : f32 to vector<6x6xf32>
    %44 = arith.mulf %43, %6 : vector<6x6xf32>
    %45 = arith.addf %41, %44 : vector<6x6xf32>
    %c1_63 = arith.constant 1 : index
    %46 = memref.load %arg1[%c1_63] : memref<90xf32, #tpu.memory_space<smem>>
    %47 = vector.broadcast %46 : f32 to vector<6x6xf32>
    %48 = arith.mulf %47, %8 : vector<6x6xf32>
    %49 = arith.addf %45, %48 : vector<6x6xf32>
    %c2_64 = arith.constant 2 : index
    %50 = memref.load %arg1[%c2_64] : memref<90xf32, #tpu.memory_space<smem>>
    %51 = vector.broadcast %50 : f32 to vector<6x6xf32>
    %52 = arith.mulf %51, %10 : vector<6x6xf32>
    %53 = arith.addf %49, %52 : vector<6x6xf32>
    %c3 = arith.constant 3 : index
    %54 = memref.load %arg1[%c3] : memref<90xf32, #tpu.memory_space<smem>>
    %55 = vector.broadcast %54 : f32 to vector<6x6xf32>
    %56 = arith.mulf %55, %12 : vector<6x6xf32>
    %57 = arith.addf %53, %56 : vector<6x6xf32>
    %c4 = arith.constant 4 : index
    %58 = memref.load %arg1[%c4] : memref<90xf32, #tpu.memory_space<smem>>
    %59 = vector.broadcast %58 : f32 to vector<6x6xf32>
    %60 = arith.mulf %59, %14 : vector<6x6xf32>
    %61 = arith.addf %57, %60 : vector<6x6xf32>
    %c5 = arith.constant 5 : index
    %62 = memref.load %arg1[%c5] : memref<90xf32, #tpu.memory_space<smem>>
    %63 = vector.broadcast %62 : f32 to vector<6x6xf32>
    %64 = arith.mulf %63, %16 : vector<6x6xf32>
    %65 = arith.addf %61, %64 : vector<6x6xf32>
    %c6 = arith.constant 6 : index
    %66 = memref.load %arg1[%c6] : memref<90xf32, #tpu.memory_space<smem>>
    %67 = vector.broadcast %66 : f32 to vector<6x6xf32>
    %68 = arith.mulf %67, %18 : vector<6x6xf32>
    %69 = arith.addf %65, %68 : vector<6x6xf32>
    %c7 = arith.constant 7 : index
    %70 = memref.load %arg1[%c7] : memref<90xf32, #tpu.memory_space<smem>>
    %71 = vector.broadcast %70 : f32 to vector<6x6xf32>
    %72 = arith.mulf %71, %20 : vector<6x6xf32>
    %73 = arith.addf %69, %72 : vector<6x6xf32>
    %c8 = arith.constant 8 : index
    %74 = memref.load %arg1[%c8] : memref<90xf32, #tpu.memory_space<smem>>
    %75 = vector.broadcast %74 : f32 to vector<6x6xf32>
    %76 = arith.mulf %75, %22 : vector<6x6xf32>
    %77 = arith.addf %73, %76 : vector<6x6xf32>
    %c9 = arith.constant 9 : index
    %78 = memref.load %arg1[%c9] : memref<90xf32, #tpu.memory_space<smem>>
    %79 = vector.broadcast %78 : f32 to vector<6x6xf32>
    %80 = arith.mulf %79, %24 : vector<6x6xf32>
    %81 = arith.addf %77, %80 : vector<6x6xf32>
    %c10 = arith.constant 10 : index
    %82 = memref.load %arg1[%c10] : memref<90xf32, #tpu.memory_space<smem>>
    %83 = vector.broadcast %82 : f32 to vector<6x6xf32>
    %84 = arith.mulf %83, %26 : vector<6x6xf32>
    %85 = arith.addf %81, %84 : vector<6x6xf32>
    %c11 = arith.constant 11 : index
    %86 = memref.load %arg1[%c11] : memref<90xf32, #tpu.memory_space<smem>>
    %87 = vector.broadcast %86 : f32 to vector<6x6xf32>
    %88 = arith.mulf %87, %28 : vector<6x6xf32>
    %89 = arith.addf %85, %88 : vector<6x6xf32>
    %c12 = arith.constant 12 : index
    %90 = memref.load %arg1[%c12] : memref<90xf32, #tpu.memory_space<smem>>
    %91 = vector.broadcast %90 : f32 to vector<6x6xf32>
    %92 = arith.mulf %91, %30 : vector<6x6xf32>
    %93 = arith.addf %89, %92 : vector<6x6xf32>
    %c13 = arith.constant 13 : index
    %94 = memref.load %arg1[%c13] : memref<90xf32, #tpu.memory_space<smem>>
    %95 = vector.broadcast %94 : f32 to vector<6x6xf32>
    %96 = arith.mulf %95, %32 : vector<6x6xf32>
    %97 = arith.addf %93, %96 : vector<6x6xf32>
    %c14 = arith.constant 14 : index
    %98 = memref.load %arg1[%c14] : memref<90xf32, #tpu.memory_space<smem>>
    %99 = vector.broadcast %98 : f32 to vector<6x6xf32>
    %100 = arith.mulf %99, %34 : vector<6x6xf32>
    %101 = arith.addf %97, %100 : vector<6x6xf32>
    %c15 = arith.constant 15 : index
    %102 = memref.load %arg1[%c15] : memref<90xf32, #tpu.memory_space<smem>>
    %103 = vector.broadcast %102 : f32 to vector<6x6xf32>
    %104 = arith.mulf %103, %36 : vector<6x6xf32>
    %105 = arith.addf %101, %104 : vector<6x6xf32>
    %c16 = arith.constant 16 : index
    %106 = memref.load %arg1[%c16] : memref<90xf32, #tpu.memory_space<smem>>
    %107 = vector.broadcast %106 : f32 to vector<6x6xf32>
    %108 = arith.mulf %107, %38 : vector<6x6xf32>
    %109 = arith.addf %105, %108 : vector<6x6xf32>
    %c17 = arith.constant 17 : index
    %110 = memref.load %arg1[%c17] : memref<90xf32, #tpu.memory_space<smem>>
    %111 = vector.broadcast %110 : f32 to vector<6x6xf32>
    %112 = arith.mulf %111, %40 : vector<6x6xf32>
    %113 = arith.addf %109, %112 : vector<6x6xf32>
    %cst_65 = arith.constant 0.000000e+00 : f32
    %114 = vector.broadcast %cst_65 : f32 to vector<6x6xf32>
    %c18 = arith.constant 18 : index
    %115 = memref.load %arg1[%c18] : memref<90xf32, #tpu.memory_space<smem>>
    %116 = vector.broadcast %115 : f32 to vector<6x6xf32>
    %117 = arith.mulf %116, %6 : vector<6x6xf32>
    %118 = arith.addf %114, %117 : vector<6x6xf32>
    %c19 = arith.constant 19 : index
    %119 = memref.load %arg1[%c19] : memref<90xf32, #tpu.memory_space<smem>>
    %120 = vector.broadcast %119 : f32 to vector<6x6xf32>
    %121 = arith.mulf %120, %8 : vector<6x6xf32>
    %122 = arith.addf %118, %121 : vector<6x6xf32>
    %c20 = arith.constant 20 : index
    %123 = memref.load %arg1[%c20] : memref<90xf32, #tpu.memory_space<smem>>
    %124 = vector.broadcast %123 : f32 to vector<6x6xf32>
    %125 = arith.mulf %124, %10 : vector<6x6xf32>
    %126 = arith.addf %122, %125 : vector<6x6xf32>
    %c21 = arith.constant 21 : index
    %127 = memref.load %arg1[%c21] : memref<90xf32, #tpu.memory_space<smem>>
    %128 = vector.broadcast %127 : f32 to vector<6x6xf32>
    %129 = arith.mulf %128, %12 : vector<6x6xf32>
    %130 = arith.addf %126, %129 : vector<6x6xf32>
    %c22 = arith.constant 22 : index
    %131 = memref.load %arg1[%c22] : memref<90xf32, #tpu.memory_space<smem>>
    %132 = vector.broadcast %131 : f32 to vector<6x6xf32>
    %133 = arith.mulf %132, %14 : vector<6x6xf32>
    %134 = arith.addf %130, %133 : vector<6x6xf32>
    %c23 = arith.constant 23 : index
    %135 = memref.load %arg1[%c23] : memref<90xf32, #tpu.memory_space<smem>>
    %136 = vector.broadcast %135 : f32 to vector<6x6xf32>
    %137 = arith.mulf %136, %16 : vector<6x6xf32>
    %138 = arith.addf %134, %137 : vector<6x6xf32>
    %c24 = arith.constant 24 : index
    %139 = memref.load %arg1[%c24] : memref<90xf32, #tpu.memory_space<smem>>
    %140 = vector.broadcast %139 : f32 to vector<6x6xf32>
    %141 = arith.mulf %140, %18 : vector<6x6xf32>
    %142 = arith.addf %138, %141 : vector<6x6xf32>
    %c25 = arith.constant 25 : index
    %143 = memref.load %arg1[%c25] : memref<90xf32, #tpu.memory_space<smem>>
    %144 = vector.broadcast %143 : f32 to vector<6x6xf32>
    %145 = arith.mulf %144, %20 : vector<6x6xf32>
    %146 = arith.addf %142, %145 : vector<6x6xf32>
    %c26 = arith.constant 26 : index
    %147 = memref.load %arg1[%c26] : memref<90xf32, #tpu.memory_space<smem>>
    %148 = vector.broadcast %147 : f32 to vector<6x6xf32>
    %149 = arith.mulf %148, %22 : vector<6x6xf32>
    %150 = arith.addf %146, %149 : vector<6x6xf32>
    %c27 = arith.constant 27 : index
    %151 = memref.load %arg1[%c27] : memref<90xf32, #tpu.memory_space<smem>>
    %152 = vector.broadcast %151 : f32 to vector<6x6xf32>
    %153 = arith.mulf %152, %24 : vector<6x6xf32>
    %154 = arith.addf %150, %153 : vector<6x6xf32>
    %c28 = arith.constant 28 : index
    %155 = memref.load %arg1[%c28] : memref<90xf32, #tpu.memory_space<smem>>
    %156 = vector.broadcast %155 : f32 to vector<6x6xf32>
    %157 = arith.mulf %156, %26 : vector<6x6xf32>
    %158 = arith.addf %154, %157 : vector<6x6xf32>
    %c29 = arith.constant 29 : index
    %159 = memref.load %arg1[%c29] : memref<90xf32, #tpu.memory_space<smem>>
    %160 = vector.broadcast %159 : f32 to vector<6x6xf32>
    %161 = arith.mulf %160, %28 : vector<6x6xf32>
    %162 = arith.addf %158, %161 : vector<6x6xf32>
    %c30 = arith.constant 30 : index
    %163 = memref.load %arg1[%c30] : memref<90xf32, #tpu.memory_space<smem>>
    %164 = vector.broadcast %163 : f32 to vector<6x6xf32>
    %165 = arith.mulf %164, %30 : vector<6x6xf32>
    %166 = arith.addf %162, %165 : vector<6x6xf32>
    %c31 = arith.constant 31 : index
    %167 = memref.load %arg1[%c31] : memref<90xf32, #tpu.memory_space<smem>>
    %168 = vector.broadcast %167 : f32 to vector<6x6xf32>
    %169 = arith.mulf %168, %32 : vector<6x6xf32>
    %170 = arith.addf %166, %169 : vector<6x6xf32>
    %c32 = arith.constant 32 : index
    %171 = memref.load %arg1[%c32] : memref<90xf32, #tpu.memory_space<smem>>
    %172 = vector.broadcast %171 : f32 to vector<6x6xf32>
    %173 = arith.mulf %172, %34 : vector<6x6xf32>
    %174 = arith.addf %170, %173 : vector<6x6xf32>
    %c33 = arith.constant 33 : index
    %175 = memref.load %arg1[%c33] : memref<90xf32, #tpu.memory_space<smem>>
    %176 = vector.broadcast %175 : f32 to vector<6x6xf32>
    %177 = arith.mulf %176, %36 : vector<6x6xf32>
    %178 = arith.addf %174, %177 : vector<6x6xf32>
    %c34 = arith.constant 34 : index
    %179 = memref.load %arg1[%c34] : memref<90xf32, #tpu.memory_space<smem>>
    %180 = vector.broadcast %179 : f32 to vector<6x6xf32>
    %181 = arith.mulf %180, %38 : vector<6x6xf32>
    %182 = arith.addf %178, %181 : vector<6x6xf32>
    %c35 = arith.constant 35 : index
    %183 = memref.load %arg1[%c35] : memref<90xf32, #tpu.memory_space<smem>>
    %184 = vector.broadcast %183 : f32 to vector<6x6xf32>
    %185 = arith.mulf %184, %40 : vector<6x6xf32>
    %186 = arith.addf %182, %185 : vector<6x6xf32>
    %cst_66 = arith.constant 0.000000e+00 : f32
    %187 = vector.broadcast %cst_66 : f32 to vector<6x6xf32>
    %c36 = arith.constant 36 : index
    %188 = memref.load %arg1[%c36] : memref<90xf32, #tpu.memory_space<smem>>
    %189 = vector.broadcast %188 : f32 to vector<6x6xf32>
    %190 = arith.mulf %189, %6 : vector<6x6xf32>
    %191 = arith.addf %187, %190 : vector<6x6xf32>
    %c37 = arith.constant 37 : index
    %192 = memref.load %arg1[%c37] : memref<90xf32, #tpu.memory_space<smem>>
    %193 = vector.broadcast %192 : f32 to vector<6x6xf32>
    %194 = arith.mulf %193, %8 : vector<6x6xf32>
    %195 = arith.addf %191, %194 : vector<6x6xf32>
    %c38 = arith.constant 38 : index
    %196 = memref.load %arg1[%c38] : memref<90xf32, #tpu.memory_space<smem>>
    %197 = vector.broadcast %196 : f32 to vector<6x6xf32>
    %198 = arith.mulf %197, %10 : vector<6x6xf32>
    %199 = arith.addf %195, %198 : vector<6x6xf32>
    %c39 = arith.constant 39 : index
    %200 = memref.load %arg1[%c39] : memref<90xf32, #tpu.memory_space<smem>>
    %201 = vector.broadcast %200 : f32 to vector<6x6xf32>
    %202 = arith.mulf %201, %12 : vector<6x6xf32>
    %203 = arith.addf %199, %202 : vector<6x6xf32>
    %c40 = arith.constant 40 : index
    %204 = memref.load %arg1[%c40] : memref<90xf32, #tpu.memory_space<smem>>
    %205 = vector.broadcast %204 : f32 to vector<6x6xf32>
    %206 = arith.mulf %205, %14 : vector<6x6xf32>
    %207 = arith.addf %203, %206 : vector<6x6xf32>
    %c41 = arith.constant 41 : index
    %208 = memref.load %arg1[%c41] : memref<90xf32, #tpu.memory_space<smem>>
    %209 = vector.broadcast %208 : f32 to vector<6x6xf32>
    %210 = arith.mulf %209, %16 : vector<6x6xf32>
    %211 = arith.addf %207, %210 : vector<6x6xf32>
    %c42 = arith.constant 42 : index
    %212 = memref.load %arg1[%c42] : memref<90xf32, #tpu.memory_space<smem>>
    %213 = vector.broadcast %212 : f32 to vector<6x6xf32>
    %214 = arith.mulf %213, %18 : vector<6x6xf32>
    %215 = arith.addf %211, %214 : vector<6x6xf32>
    %c43 = arith.constant 43 : index
    %216 = memref.load %arg1[%c43] : memref<90xf32, #tpu.memory_space<smem>>
    %217 = vector.broadcast %216 : f32 to vector<6x6xf32>
    %218 = arith.mulf %217, %20 : vector<6x6xf32>
    %219 = arith.addf %215, %218 : vector<6x6xf32>
    %c44 = arith.constant 44 : index
    %220 = memref.load %arg1[%c44] : memref<90xf32, #tpu.memory_space<smem>>
    %221 = vector.broadcast %220 : f32 to vector<6x6xf32>
    %222 = arith.mulf %221, %22 : vector<6x6xf32>
    %223 = arith.addf %219, %222 : vector<6x6xf32>
    %c45 = arith.constant 45 : index
    %224 = memref.load %arg1[%c45] : memref<90xf32, #tpu.memory_space<smem>>
    %225 = vector.broadcast %224 : f32 to vector<6x6xf32>
    %226 = arith.mulf %225, %24 : vector<6x6xf32>
    %227 = arith.addf %223, %226 : vector<6x6xf32>
    %c46 = arith.constant 46 : index
    %228 = memref.load %arg1[%c46] : memref<90xf32, #tpu.memory_space<smem>>
    %229 = vector.broadcast %228 : f32 to vector<6x6xf32>
    %230 = arith.mulf %229, %26 : vector<6x6xf32>
    %231 = arith.addf %227, %230 : vector<6x6xf32>
    %c47 = arith.constant 47 : index
    %232 = memref.load %arg1[%c47] : memref<90xf32, #tpu.memory_space<smem>>
    %233 = vector.broadcast %232 : f32 to vector<6x6xf32>
    %234 = arith.mulf %233, %28 : vector<6x6xf32>
    %235 = arith.addf %231, %234 : vector<6x6xf32>
    %c48 = arith.constant 48 : index
    %236 = memref.load %arg1[%c48] : memref<90xf32, #tpu.memory_space<smem>>
    %237 = vector.broadcast %236 : f32 to vector<6x6xf32>
    %238 = arith.mulf %237, %30 : vector<6x6xf32>
    %239 = arith.addf %235, %238 : vector<6x6xf32>
    %c49 = arith.constant 49 : index
    %240 = memref.load %arg1[%c49] : memref<90xf32, #tpu.memory_space<smem>>
    %241 = vector.broadcast %240 : f32 to vector<6x6xf32>
    %242 = arith.mulf %241, %32 : vector<6x6xf32>
    %243 = arith.addf %239, %242 : vector<6x6xf32>
    %c50 = arith.constant 50 : index
    %244 = memref.load %arg1[%c50] : memref<90xf32, #tpu.memory_space<smem>>
    %245 = vector.broadcast %244 : f32 to vector<6x6xf32>
    %246 = arith.mulf %245, %34 : vector<6x6xf32>
    %247 = arith.addf %243, %246 : vector<6x6xf32>
    %c51 = arith.constant 51 : index
    %248 = memref.load %arg1[%c51] : memref<90xf32, #tpu.memory_space<smem>>
    %249 = vector.broadcast %248 : f32 to vector<6x6xf32>
    %250 = arith.mulf %249, %36 : vector<6x6xf32>
    %251 = arith.addf %247, %250 : vector<6x6xf32>
    %c52 = arith.constant 52 : index
    %252 = memref.load %arg1[%c52] : memref<90xf32, #tpu.memory_space<smem>>
    %253 = vector.broadcast %252 : f32 to vector<6x6xf32>
    %254 = arith.mulf %253, %38 : vector<6x6xf32>
    %255 = arith.addf %251, %254 : vector<6x6xf32>
    %c53 = arith.constant 53 : index
    %256 = memref.load %arg1[%c53] : memref<90xf32, #tpu.memory_space<smem>>
    %257 = vector.broadcast %256 : f32 to vector<6x6xf32>
    %258 = arith.mulf %257, %40 : vector<6x6xf32>
    %259 = arith.addf %255, %258 : vector<6x6xf32>
    %cst_67 = arith.constant 0.000000e+00 : f32
    %260 = vector.broadcast %cst_67 : f32 to vector<6x6xf32>
    %c54 = arith.constant 54 : index
    %261 = memref.load %arg1[%c54] : memref<90xf32, #tpu.memory_space<smem>>
    %262 = vector.broadcast %261 : f32 to vector<6x6xf32>
    %263 = arith.mulf %262, %6 : vector<6x6xf32>
    %264 = arith.addf %260, %263 : vector<6x6xf32>
    %c55 = arith.constant 55 : index
    %265 = memref.load %arg1[%c55] : memref<90xf32, #tpu.memory_space<smem>>
    %266 = vector.broadcast %265 : f32 to vector<6x6xf32>
    %267 = arith.mulf %266, %8 : vector<6x6xf32>
    %268 = arith.addf %264, %267 : vector<6x6xf32>
    %c56 = arith.constant 56 : index
    %269 = memref.load %arg1[%c56] : memref<90xf32, #tpu.memory_space<smem>>
    %270 = vector.broadcast %269 : f32 to vector<6x6xf32>
    %271 = arith.mulf %270, %10 : vector<6x6xf32>
    %272 = arith.addf %268, %271 : vector<6x6xf32>
    %c57 = arith.constant 57 : index
    %273 = memref.load %arg1[%c57] : memref<90xf32, #tpu.memory_space<smem>>
    %274 = vector.broadcast %273 : f32 to vector<6x6xf32>
    %275 = arith.mulf %274, %12 : vector<6x6xf32>
    %276 = arith.addf %272, %275 : vector<6x6xf32>
    %c58 = arith.constant 58 : index
    %277 = memref.load %arg1[%c58] : memref<90xf32, #tpu.memory_space<smem>>
    %278 = vector.broadcast %277 : f32 to vector<6x6xf32>
    %279 = arith.mulf %278, %14 : vector<6x6xf32>
    %280 = arith.addf %276, %279 : vector<6x6xf32>
    %c59 = arith.constant 59 : index
    %281 = memref.load %arg1[%c59] : memref<90xf32, #tpu.memory_space<smem>>
    %282 = vector.broadcast %281 : f32 to vector<6x6xf32>
    %283 = arith.mulf %282, %16 : vector<6x6xf32>
    %284 = arith.addf %280, %283 : vector<6x6xf32>
    %c60 = arith.constant 60 : index
    %285 = memref.load %arg1[%c60] : memref<90xf32, #tpu.memory_space<smem>>
    %286 = vector.broadcast %285 : f32 to vector<6x6xf32>
    %287 = arith.mulf %286, %18 : vector<6x6xf32>
    %288 = arith.addf %284, %287 : vector<6x6xf32>
    %c61 = arith.constant 61 : index
    %289 = memref.load %arg1[%c61] : memref<90xf32, #tpu.memory_space<smem>>
    %290 = vector.broadcast %289 : f32 to vector<6x6xf32>
    %291 = arith.mulf %290, %20 : vector<6x6xf32>
    %292 = arith.addf %288, %291 : vector<6x6xf32>
    %c62 = arith.constant 62 : index
    %293 = memref.load %arg1[%c62] : memref<90xf32, #tpu.memory_space<smem>>
    %294 = vector.broadcast %293 : f32 to vector<6x6xf32>
    %295 = arith.mulf %294, %22 : vector<6x6xf32>
    %296 = arith.addf %292, %295 : vector<6x6xf32>
    %c63 = arith.constant 63 : index
    %297 = memref.load %arg1[%c63] : memref<90xf32, #tpu.memory_space<smem>>
    %298 = vector.broadcast %297 : f32 to vector<6x6xf32>
    %299 = arith.mulf %298, %24 : vector<6x6xf32>
    %300 = arith.addf %296, %299 : vector<6x6xf32>
    %c64 = arith.constant 64 : index
    %301 = memref.load %arg1[%c64] : memref<90xf32, #tpu.memory_space<smem>>
    %302 = vector.broadcast %301 : f32 to vector<6x6xf32>
    %303 = arith.mulf %302, %26 : vector<6x6xf32>
    %304 = arith.addf %300, %303 : vector<6x6xf32>
    %c65 = arith.constant 65 : index
    %305 = memref.load %arg1[%c65] : memref<90xf32, #tpu.memory_space<smem>>
    %306 = vector.broadcast %305 : f32 to vector<6x6xf32>
    %307 = arith.mulf %306, %28 : vector<6x6xf32>
    %308 = arith.addf %304, %307 : vector<6x6xf32>
    %c66 = arith.constant 66 : index
    %309 = memref.load %arg1[%c66] : memref<90xf32, #tpu.memory_space<smem>>
    %310 = vector.broadcast %309 : f32 to vector<6x6xf32>
    %311 = arith.mulf %310, %30 : vector<6x6xf32>
    %312 = arith.addf %308, %311 : vector<6x6xf32>
    %c67 = arith.constant 67 : index
    %313 = memref.load %arg1[%c67] : memref<90xf32, #tpu.memory_space<smem>>
    %314 = vector.broadcast %313 : f32 to vector<6x6xf32>
    %315 = arith.mulf %314, %32 : vector<6x6xf32>
    %316 = arith.addf %312, %315 : vector<6x6xf32>
    %c68 = arith.constant 68 : index
    %317 = memref.load %arg1[%c68] : memref<90xf32, #tpu.memory_space<smem>>
    %318 = vector.broadcast %317 : f32 to vector<6x6xf32>
    %319 = arith.mulf %318, %34 : vector<6x6xf32>
    %320 = arith.addf %316, %319 : vector<6x6xf32>
    %c69 = arith.constant 69 : index
    %321 = memref.load %arg1[%c69] : memref<90xf32, #tpu.memory_space<smem>>
    %322 = vector.broadcast %321 : f32 to vector<6x6xf32>
    %323 = arith.mulf %322, %36 : vector<6x6xf32>
    %324 = arith.addf %320, %323 : vector<6x6xf32>
    %c70 = arith.constant 70 : index
    %325 = memref.load %arg1[%c70] : memref<90xf32, #tpu.memory_space<smem>>
    %326 = vector.broadcast %325 : f32 to vector<6x6xf32>
    %327 = arith.mulf %326, %38 : vector<6x6xf32>
    %328 = arith.addf %324, %327 : vector<6x6xf32>
    %c71 = arith.constant 71 : index
    %329 = memref.load %arg1[%c71] : memref<90xf32, #tpu.memory_space<smem>>
    %330 = vector.broadcast %329 : f32 to vector<6x6xf32>
    %331 = arith.mulf %330, %40 : vector<6x6xf32>
    %332 = arith.addf %328, %331 : vector<6x6xf32>
    %cst_68 = arith.constant 0.000000e+00 : f32
    %333 = vector.broadcast %cst_68 : f32 to vector<6x6xf32>
    %c72 = arith.constant 72 : index
    %334 = memref.load %arg1[%c72] : memref<90xf32, #tpu.memory_space<smem>>
    %335 = vector.broadcast %334 : f32 to vector<6x6xf32>
    %336 = arith.mulf %335, %6 : vector<6x6xf32>
    %337 = arith.addf %333, %336 : vector<6x6xf32>
    %c73 = arith.constant 73 : index
    %338 = memref.load %arg1[%c73] : memref<90xf32, #tpu.memory_space<smem>>
    %339 = vector.broadcast %338 : f32 to vector<6x6xf32>
    %340 = arith.mulf %339, %8 : vector<6x6xf32>
    %341 = arith.addf %337, %340 : vector<6x6xf32>
    %c74 = arith.constant 74 : index
    %342 = memref.load %arg1[%c74] : memref<90xf32, #tpu.memory_space<smem>>
    %343 = vector.broadcast %342 : f32 to vector<6x6xf32>
    %344 = arith.mulf %343, %10 : vector<6x6xf32>
    %345 = arith.addf %341, %344 : vector<6x6xf32>
    %c75 = arith.constant 75 : index
    %346 = memref.load %arg1[%c75] : memref<90xf32, #tpu.memory_space<smem>>
    %347 = vector.broadcast %346 : f32 to vector<6x6xf32>
    %348 = arith.mulf %347, %12 : vector<6x6xf32>
    %349 = arith.addf %345, %348 : vector<6x6xf32>
    %c76 = arith.constant 76 : index
    %350 = memref.load %arg1[%c76] : memref<90xf32, #tpu.memory_space<smem>>
    %351 = vector.broadcast %350 : f32 to vector<6x6xf32>
    %352 = arith.mulf %351, %14 : vector<6x6xf32>
    %353 = arith.addf %349, %352 : vector<6x6xf32>
    %c77 = arith.constant 77 : index
    %354 = memref.load %arg1[%c77] : memref<90xf32, #tpu.memory_space<smem>>
    %355 = vector.broadcast %354 : f32 to vector<6x6xf32>
    %356 = arith.mulf %355, %16 : vector<6x6xf32>
    %357 = arith.addf %353, %356 : vector<6x6xf32>
    %c78 = arith.constant 78 : index
    %358 = memref.load %arg1[%c78] : memref<90xf32, #tpu.memory_space<smem>>
    %359 = vector.broadcast %358 : f32 to vector<6x6xf32>
    %360 = arith.mulf %359, %18 : vector<6x6xf32>
    %361 = arith.addf %357, %360 : vector<6x6xf32>
    %c79 = arith.constant 79 : index
    %362 = memref.load %arg1[%c79] : memref<90xf32, #tpu.memory_space<smem>>
    %363 = vector.broadcast %362 : f32 to vector<6x6xf32>
    %364 = arith.mulf %363, %20 : vector<6x6xf32>
    %365 = arith.addf %361, %364 : vector<6x6xf32>
    %c80 = arith.constant 80 : index
    %366 = memref.load %arg1[%c80] : memref<90xf32, #tpu.memory_space<smem>>
    %367 = vector.broadcast %366 : f32 to vector<6x6xf32>
    %368 = arith.mulf %367, %22 : vector<6x6xf32>
    %369 = arith.addf %365, %368 : vector<6x6xf32>
    %c81 = arith.constant 81 : index
    %370 = memref.load %arg1[%c81] : memref<90xf32, #tpu.memory_space<smem>>
    %371 = vector.broadcast %370 : f32 to vector<6x6xf32>
    %372 = arith.mulf %371, %24 : vector<6x6xf32>
    %373 = arith.addf %369, %372 : vector<6x6xf32>
    %c82 = arith.constant 82 : index
    %374 = memref.load %arg1[%c82] : memref<90xf32, #tpu.memory_space<smem>>
    %375 = vector.broadcast %374 : f32 to vector<6x6xf32>
    %376 = arith.mulf %375, %26 : vector<6x6xf32>
    %377 = arith.addf %373, %376 : vector<6x6xf32>
    %c83 = arith.constant 83 : index
    %378 = memref.load %arg1[%c83] : memref<90xf32, #tpu.memory_space<smem>>
    %379 = vector.broadcast %378 : f32 to vector<6x6xf32>
    %380 = arith.mulf %379, %28 : vector<6x6xf32>
    %381 = arith.addf %377, %380 : vector<6x6xf32>
    %c84 = arith.constant 84 : index
    %382 = memref.load %arg1[%c84] : memref<90xf32, #tpu.memory_space<smem>>
    %383 = vector.broadcast %382 : f32 to vector<6x6xf32>
    %384 = arith.mulf %383, %30 : vector<6x6xf32>
    %385 = arith.addf %381, %384 : vector<6x6xf32>
    %c85 = arith.constant 85 : index
    %386 = memref.load %arg1[%c85] : memref<90xf32, #tpu.memory_space<smem>>
    %387 = vector.broadcast %386 : f32 to vector<6x6xf32>
    %388 = arith.mulf %387, %32 : vector<6x6xf32>
    %389 = arith.addf %385, %388 : vector<6x6xf32>
    %c86 = arith.constant 86 : index
    %390 = memref.load %arg1[%c86] : memref<90xf32, #tpu.memory_space<smem>>
    %391 = vector.broadcast %390 : f32 to vector<6x6xf32>
    %392 = arith.mulf %391, %34 : vector<6x6xf32>
    %393 = arith.addf %389, %392 : vector<6x6xf32>
    %c87 = arith.constant 87 : index
    %394 = memref.load %arg1[%c87] : memref<90xf32, #tpu.memory_space<smem>>
    %395 = vector.broadcast %394 : f32 to vector<6x6xf32>
    %396 = arith.mulf %395, %36 : vector<6x6xf32>
    %397 = arith.addf %393, %396 : vector<6x6xf32>
    %c88 = arith.constant 88 : index
    %398 = memref.load %arg1[%c88] : memref<90xf32, #tpu.memory_space<smem>>
    %399 = vector.broadcast %398 : f32 to vector<6x6xf32>
    %400 = arith.mulf %399, %38 : vector<6x6xf32>
    %401 = arith.addf %397, %400 : vector<6x6xf32>
    %c89 = arith.constant 89 : index
    %402 = memref.load %arg1[%c89] : memref<90xf32, #tpu.memory_space<smem>>
    %403 = vector.broadcast %402 : f32 to vector<6x6xf32>
    %404 = arith.mulf %403, %40 : vector<6x6xf32>
    %405 = arith.addf %401, %404 : vector<6x6xf32>
    %cst_69 = arith.constant 0.000000e+00 : f32
    %406 = vector.broadcast %cst_69 : f32 to vector<6x6xf32>
    %cst_70 = arith.constant 0.000000e+00 : f32
    %407 = vector.broadcast %cst_70 : f32 to vector<6x6xf32>
    %cst_71 = arith.constant 0.000000e+00 : f32
    %408 = vector.broadcast %cst_71 : f32 to vector<6x6xf32>
    %409 = vector.shape_cast %113 : vector<6x6xf32> to vector<1x6x6xf32>
    %410 = vector.shape_cast %186 : vector<6x6xf32> to vector<1x6x6xf32>
    %411 = vector.shape_cast %259 : vector<6x6xf32> to vector<1x6x6xf32>
    %412 = vector.shape_cast %332 : vector<6x6xf32> to vector<1x6x6xf32>
    %413 = vector.shape_cast %405 : vector<6x6xf32> to vector<1x6x6xf32>
    %414 = vector.shape_cast %406 : vector<6x6xf32> to vector<1x6x6xf32>
    %415 = vector.shape_cast %407 : vector<6x6xf32> to vector<1x6x6xf32>
    %416 = vector.shape_cast %408 : vector<6x6xf32> to vector<1x6x6xf32>
    %417 = tpu.concatenate %409, %410, %411, %412, %413, %414, %415, %416 in 0 : vector<1x6x6xf32>, vector<1x6x6xf32>, vector<1x6x6xf32>, vector<1x6x6xf32>, vector<1x6x6xf32>, vector<1x6x6xf32>, vector<1x6x6xf32>, vector<1x6x6xf32> -> vector<8x6x6xf32>
    %418 = vector.shape_cast %417 : vector<8x6x6xf32> to vector<8x36xf32>
    %cst_72 = arith.constant dense<0.000000e+00> : vector<8xf32>
    %419 = vector.multi_reduction <add>, %418, %cst_72 [1] : vector<8x36xf32> to vector<8xf32>
    %420 = vector.shape_cast %419 : vector<8xf32> to vector<8x1xf32>
    %421 = arith.mulf %418, %418 : vector<8x36xf32>
    %cst_73 = arith.constant dense<0.000000e+00> : vector<8xf32>
    %422 = vector.multi_reduction <add>, %421, %cst_73 [1] : vector<8x36xf32> to vector<8xf32>
    %423 = vector.shape_cast %422 : vector<8xf32> to vector<8x1xf32>
    %cst_74 = arith.constant 0.027777778 : f32
    %424 = vector.broadcast %cst_74 : f32 to vector<8x1xf32>
    %425 = arith.mulf %420, %424 : vector<8x1xf32>
    %cst_75 = arith.constant 0.027777778 : f32
    %426 = vector.broadcast %cst_75 : f32 to vector<8x1xf32>
    %427 = arith.mulf %423, %426 : vector<8x1xf32>
    %428 = arith.mulf %425, %425 : vector<8x1xf32>
    %429 = arith.subf %427, %428 : vector<8x1xf32>
    %430 = vector.broadcast %425 : vector<8x1xf32> to vector<8x36xf32>
    %431 = arith.subf %418, %430 : vector<8x36xf32>
    %cst_76 = arith.constant 9.99999974E-6 : f32
    %432 = vector.broadcast %cst_76 : f32 to vector<8x1xf32>
    %433 = arith.addf %429, %432 : vector<8x1xf32>
    %434 = math.rsqrt %433 : vector<8x1xf32>
    %435 = vector.broadcast %434 : vector<8x1xf32> to vector<8x36xf32>
    %436 = arith.mulf %431, %435 : vector<8x36xf32>
    %c0_77 = arith.constant 0 : index
    %c0_78 = arith.constant 0 : index
    %437 = vector.load %arg2[%c0_77, %c0_78] : memref<8x1xf32, #tpu.memory_space<vmem>>, vector<8x1xf32>
    %438 = vector.broadcast %437 : vector<8x1xf32> to vector<8x36xf32>
    %439 = arith.mulf %436, %438 : vector<8x36xf32>
    %c0_79 = arith.constant 0 : index
    %c0_80 = arith.constant 0 : index
    %440 = vector.load %arg3[%c0_79, %c0_80] : memref<8x1xf32, #tpu.memory_space<vmem>>, vector<8x1xf32>
    %441 = vector.broadcast %440 : vector<8x1xf32> to vector<8x36xf32>
    %442 = arith.addf %439, %441 : vector<8x36xf32>
    %c0_81 = arith.constant 0 : index
    %c0_82 = arith.constant 0 : index
    %443 = vector.load %arg4[%c0_81, %c0_82] : memref<8x36xf32, #tpu.memory_space<vmem>>, vector<8x36xf32>
    tpu.vector_store %arg4[%c0_81, %c0_82], %442 {strides = array<i32>} : memref<8x36xf32, #tpu.memory_space<vmem>>, vector<8x36xf32>,
    return
  }
}

</mosaic_0001>

<bundles_post_ra>
// kernel: tpu_custom_call.1
= control target key start
LH: loop header
LB: loop body
LE: loop exit
PB: predicated region body
PF: predicated region fallthrough
CT: control target
= control target key end

     0   :  { %9 = vsyncpa [#allocation5], 0  ;;  %s1232_s0 = inlined_call_operand.vmem [shape: f32[1,2,4,4], index: 0, kind: input, shape index: {}]   ;;  %s1233_s1 = inlined_call_operand.vmem [shape: f32[90], index: 1, kind: input, shape index: {}]   ;;  %s1234_s2 = inlined_call_operand.vmem [shape: f32[8,1], index: 2, kind: input, shape index: {}]   ;;  %s1235_s3 = inlined_call_operand.vmem [shape: f32[8,1], index: 3, kind: input, shape index: {}]   ;;  %s1236_s4 = inlined_call_operand.hbm [shape: f32[8,36], index: 4, kind: output, shape index: {}]  }
   0x1   :  { %10 = vsyncpa [#allocation4], 0  ;;  %s19_s17 = sshll.u32 %s1233_s1, 4  ;;  %s20_s17 = int_to_ptr.vmem [resolvable:$true] %s19_s17 }
   0x2   :  { %s955_s18 = scalar_lea.vmem %s20_s17, 16  ;;  %p960_p1 = scmp.lt.s32.totalorder %s20_s17, %s20_s17 }
   0x3   :  { %p956_p0 = scmp.ne.s32.totalorder %s20_s17, %s955_s18  ;;  %p961_p2 = scmp.lt.s32.totalorder %s955_s18, %s955_s18 }
   0x5   :  { %p962_p3 = por %p961_p2, %p960_p1 }
   0x7   :  { %p963_p4 = pnand %p962_p3, %p956_p0 }
   0x9   :  { %966 = shalt.err (!%p963_p4)
}
   0xa   :  { %s993_s19 = smov [#allocation3]  }
   0xb   :  { %22 = dma.vmem_to_smem %s20_s17, 16, %s993_s19, [#allocation5]  }
   0xc   :  { %989 = dma.done.wait [#allocation5], 16  }
   0xd   :  { %990 = vsyncadd [#allocation5], 4294967280 }
   0xe   :  { %30 = sfence }
   0xf   :  { %v34_v0 = vld [vmem:[%s1232_s0] sm:$0xf]  ;;  %s994_s22 = smov 2   ;;  %vm31_vm0 = vcmask 64512   ;;  %v35_v1 = vld [vmem:[%s1232_s0 + $0x4] sm:$0xf] }
  0x10   :  { %38 = vrot.lane.b32.xlu0 %v34_v0, %s994_s22  ;;  %v995_v2 = vmov 0.0   ;;  %vm44_vm1 = vcmask 44048   ;;  %s884_s24 = sld [smem:[#allocation3 + $0x25]]  ;;  %s848_s25 = sld [smem:[#allocation3 + $0x1]]  ;;  %vm792_vm2 = vcmask 48128   ;;  %vm794_vm3 = vcmask 97280  }
  0x11   :  { %32 = vst.msk [vmem:[#allocation2] sm:$0xff] %vm31_vm0, %v995_v2  ;;  %33 = vst.msk [vmem:[#allocation2 + $0x8] sm:$0xff] %vm31_vm0, %v995_v2  ;;  %s920_s26 = sld [smem:[#allocation3 + $0x49]]  ;;  %s866_s27 = sld [smem:[#allocation3 + $0x13]]  ;;  %vm796_vm4 = vcmask 146432   ;;  %vm798_vm5 = vcmask 195584  }
  0x12   :  { %s867_s28 = sld [smem:[#allocation3 + $0x14]]  ;;  %s902_s29 = sld [smem:[#allocation3 + $0x37]]  ;;  %vm800_vm6 = vcmask 244736   ;;  %vm802_vm7 = vcmask 293888  }
  0x13   :  { %s903_s0 = sld [smem:[#allocation3 + $0x38]]  ;;  %s849_s30 = sld [smem:[#allocation3 + $0x2]] }
  0x14   :  { %40 = vrot.lane.b32.xlu0 %v35_v1, %s994_s22  ;;  %s996_s5 = smov 127   ;;  %s851_s6 = sld [smem:[#allocation3 + $0x4]] }
  0x15   :  { %s885_s7 = sld [smem:[#allocation3 + $0x26]]  ;;  %s887_s8 = sld [smem:[#allocation3 + $0x28]] }
  0x16   :  { %v299_v5 = vstv %s884_s24  ;;  %v59_v6 = vstv %s848_s25  ;;  %s921_s9 = sld [smem:[#allocation3 + $0x4a]]  ;;  %s997_s10 = smov 126  }
  0x17   :  { %v539_v10 = vstv %s920_s26  ;;  %v179_v11 = vstv %s866_s27  ;;  %s923_s11 = sld [smem:[#allocation3 + $0x4c]]  ;;  %s869_s12 = sld [smem:[#allocation3 + $0x16]] }
  0x18   :  { %v187_v14 = vstv %s867_s28  ;;  %v419_v15 = vstv %s902_s29  ;;  %s870_s13 = sld [smem:[#allocation3 + $0x17]]  ;;  %s905_s14 = sld [smem:[#allocation3 + $0x3a]] }
  0x19   :  { %v427_v18 = vstv %s903_s0  ;;  %v67_v19 = vstv %s849_s30  ;;  %s906_s15 = sld [smem:[#allocation3 + $0x3b]]  ;;  %s852_s16 = sld [smem:[#allocation3 + $0x5]] }
  0x1a   :  { %v79_v23 = vstv %s851_s6  ;;  %s854_s17 = sld [smem:[#allocation3 + $0x7]]  ;;  %s888_s18 = sld [smem:[#allocation3 + $0x29]] }
  0x1b   :  { %v307_v24 = vstv %s885_s7  ;;  %v319_v27 = vstv %s887_s8  ;;  %s890_s19 = sld [smem:[#allocation3 + $0x2b]]  ;;  %s924_s20 = sld [smem:[#allocation3 + $0x4d]] }
  0x1c   :  { %v547_v28 = vstv %s921_s9  ;;  %s926_s21 = sld [smem:[#allocation3 + $0x4f]]  ;;  %s872_s22 = sld [smem:[#allocation3 + $0x19]] }
  0x1d   :  { %v559_v31 = vstv %s923_s11  ;;  %v199_v32 = vstv %s869_s12  ;;  %s873_s1 = sld [smem:[#allocation3 + $0x1a]]  ;;  %s908_s23 = sld [smem:[#allocation3 + $0x3d]] }
  0x1e   :  { %v207_v35 = vstv %s870_s13  ;;  %v439_v36 = vstv %s905_s14  ;;  %s909_s24 = sld [smem:[#allocation3 + $0x3e]]  ;;  %s855_s25 = sld [smem:[#allocation3 + $0x8]] }
  0x1f   :  { %v447_v39 = vstv %s906_s15  ;;  %v87_v40 = vstv %s852_s16  ;;  %s857_s26 = sld [smem:[#allocation3 + $0xa]]  ;;  %s891_s27 = sld [smem:[#allocation3 + $0x2c]] }
  0x20   :  { %v99_v44 = vstv %s854_s17  ;;  %v327_v45 = vstv %s888_s18  ;;  %s893_s28 = sld [smem:[#allocation3 + $0x2e]]  ;;  %s927_s29 = sld [smem:[#allocation3 + $0x50]] }
  0x21   :  { %v339_v48 = vstv %s890_s19  ;;  %v567_v49 = vstv %s924_s20  ;;  %s929_s0 = sld [smem:[#allocation3 + $0x52]]  ;;  %s875_s30 = sld [smem:[#allocation3 + $0x1c]] }
  0x22   :  { %v579_v52 = vstv %s926_s21  ;;  %v219_v53 = vstv %s872_s22  ;;  %s876_s6 = sld [smem:[#allocation3 + $0x1d]]  ;;  %s911_s7 = sld [smem:[#allocation3 + $0x40]] }
  0x23   :  { %v227_v56 = vstv %s873_s1  ;;  %v459_v57 = vstv %s908_s23  ;;  %s912_s8 = sld [smem:[#allocation3 + $0x41]]  ;;  %s858_s9 = sld [smem:[#allocation3 + $0xb]] }
  0x24   :  { %v467_v60 = vstv %s909_s24  ;;  %v107_v61 = vstv %s855_s25  ;;  %s860_s11 = sld [smem:[#allocation3 + $0xd]]  ;;  %s894_s12 = sld [smem:[#allocation3 + $0x2f]] }
  0x25   :  { %v119_v63 = vstv %s857_s26  ;;  %s896_s13 = sld [smem:[#allocation3 + $0x31]]  ;;  %s930_s14 = sld [smem:[#allocation3 + $0x53]] }
  0x26   :  { %s932_s15 = sld [smem:[#allocation3 + $0x55]]  ;;  %s878_s16 = sld [smem:[#allocation3 + $0x1f]] }
  0x27   :  { %s879_s17 = sld [smem:[#allocation3 + $0x20]]  ;;  %s914_s18 = sld [smem:[#allocation3 + $0x43]] }
  0x28   :  { %s915_s19 = sld [smem:[#allocation3 + $0x44]]  ;;  %s861_s20 = sld [smem:[#allocation3 + $0xe]] }
  0x29   :  { %s863_s21 = sld [smem:[#allocation3 + $0x10]]  ;;  %s897_s22 = sld [smem:[#allocation3 + $0x32]] }
  0x2a   :  { %s899_s1 = sld [smem:[#allocation3 + $0x34]]  ;;  %s933_s23 = sld [smem:[#allocation3 + $0x56]] }
  0x2b   :  { %s935_s24 = sld [smem:[#allocation3 + $0x58]]  ;;  %s881_s25 = sld [smem:[#allocation3 + $0x22]] }
  0x2c   :  { %s882_s26 = sld [smem:[#allocation3 + $0x23]] }
  0x82   :  { %v39_v3 = vpop.permute.xlu0 %38 }
  0x83   :  { %45 = vst.msk [vmem:[#allocation2 + $0x2] sm:$0xf] %vm44_vm1, %v39_v3  ;;  %v347_v3 = vstv %s891_s27  ;;  %s917_s27 = sld [smem:[#allocation3 + $0x46]] }
  0x86   :  { %v41_v4 = vpop.permute.xlu0 %40 }
  0x87   :  { %46 = vst.msk [vmem:[#allocation2 + $0xa] sm:$0xf] %vm44_vm1, %v41_v4 }
  0x8a   :  { %v1043_v7 = vld [vmem:[#allocation2] sm:$0x3f] }
  0x8b   :  { %v300_v8 = vmul.f32 %v299_v5, %v1043_v7  ;;  %v60_v9 = vmul.f32 %v59_v6, %v1043_v7  ;;  %v540_v12 = vmul.f32 %v539_v10, %v1043_v7  ;;  %v180_v13 = vmul.f32 %v179_v11, %v1043_v7  ;;  %v1059_v22 = vld [vmem:[#allocation2 + $0x1] sm:$0x3f] }
  0x8c   :  { %v188_v16 = vmul.f32 %v187_v14, %v1043_v7  ;;  %v420_v17 = vmul.f32 %v419_v15, %v1043_v7  ;;  %v428_v20 = vmul.f32 %v427_v18, %v1043_v7  ;;  %v68_v21 = vmul.f32 %v67_v19, %v1043_v7  ;;  %v1081_v43 = vld [vmem:[#allocation2 + $0x2] sm:$0x3f] }
  0x8d   :  { %302 = vrot.lane.b32.xlu0 %v300_v8, %s996_s5  ;;  %62 = vrot.lane.b32.xlu1 %v60_v9, %s996_s5  ;;  %v80_v25 = vmul.f32 %v79_v23, %v1059_v22  ;;  %v308_v26 = vmul.f32 %v307_v24, %v1043_v7  ;;  %v320_v29 = vmul.f32 %v319_v27, %v1059_v22  ;;  %v359_v5 = vstv %s893_s28  ;;  %s918_s28 = sld [smem:[#allocation3 + $0x47]] }
  0x8e   :  { %v548_v30 = vmul.f32 %v547_v28, %v1043_v7  ;;  %v560_v33 = vmul.f32 %v559_v31, %v1059_v22  ;;  %v200_v34 = vmul.f32 %v199_v32, %v1059_v22  ;;  %v208_v37 = vmul.f32 %v207_v35, %v1059_v22  ;;  %v1101_v62 = vld [vmem:[#allocation2 + $0x8] sm:$0x3f] }
  0x8f   :  { %v440_v38 = vmul.f32 %v439_v36, %v1059_v22  ;;  %v448_v41 = vmul.f32 %v447_v39, %v1059_v22  ;;  %v88_v42 = vmul.f32 %v87_v40, %v1059_v22  ;;  %v100_v46 = vmul.f32 %v99_v44, %v1081_v43  ;;  %v1125_v24 = vld [vmem:[#allocation2 + $0x9] sm:$0x3f] }
  0x90   :  { %v328_v47 = vmul.f32 %v327_v45, %v1059_v22  ;;  %v340_v50 = vmul.f32 %v339_v48, %v1081_v43  ;;  %v568_v51 = vmul.f32 %v567_v49, %v1059_v22  ;;  %v580_v54 = vmul.f32 %v579_v52, %v1081_v43 }
  0x91   :  { %542 = vrot.lane.b32.xlu0 %v540_v12, %s996_s5  ;;  %182 = vrot.lane.b32.xlu1 %v180_v13, %s996_s5  ;;  %v220_v55 = vmul.f32 %v219_v53, %v1081_v43  ;;  %v228_v58 = vmul.f32 %v227_v56, %v1081_v43  ;;  %v460_v59 = vmul.f32 %v459_v57, %v1081_v43  ;;  %v587_v8 = vstv %s927_s29  ;;  %s864_s29 = sld [smem:[#allocation3 + $0x11]] }
  0x92   :  { %v468_v0 = vmul.f32 %v467_v60, %v1081_v43  ;;  %v108_v1 = vmul.f32 %v107_v61, %v1081_v43  ;;  %v120_v4 = vmul.f32 %v119_v63, %v1101_v62  ;;  %v348_v6 = vmul.f32 %v347_v3, %v1081_v43 }
  0x93   :  { %v360_v9 = vmul.f32 %v359_v5, %v1101_v62  ;;  %v599_v10 = vstv %s929_s0  ;;  %v239_v11 = vstv %s875_s30  ;;  %v588_v12 = vmul.f32 %v587_v8, %v1081_v43  ;;  %s883_s0 = sld [smem:[#allocation3 + $0x24]]  ;;  %s54_s30 = sld [smem:[#allocation3]] }
  0x94   :  { %v600_v13 = vmul.f32 %v599_v10, %v1101_v62  ;;  %v240_v14 = vmul.f32 %v239_v11, %v1101_v62  ;;  %v247_v15 = vstv %s876_s6  ;;  %v487_v19 = vstv %s912_s8  ;;  %s900_s6 = sld [smem:[#allocation3 + $0x35]]  ;;  %s865_s8 = sld [smem:[#allocation3 + $0x12]] }
  0x95   :  { %190 = vrot.lane.b32.xlu0 %v188_v16, %s997_s10  ;;  %422 = vrot.lane.b32.xlu1 %v420_v17, %s996_s5  ;;  %v479_v16 = vstv %s911_s7  ;;  %v248_v17 = vmul.f32 %v247_v15, %v1101_v62  ;;  %v387_v48 = vstv %s897_s22  ;;  %s919_s7 = sld [smem:[#allocation3 + $0x48]]  ;;  %s910_s22 = sld [smem:[#allocation3 + $0x3f]] }
  0x96   :  { %v480_v18 = vmul.f32 %v479_v16, %v1101_v62  ;;  %v627_v52 = vstv %s933_s23  ;;  %v279_v56 = vstv %s881_s25  ;;  %v519_v60 = vstv %s917_s27  ;;  %s928_s23 = sld [smem:[#allocation3 + $0x51]]  ;;  %s859_s25 = sld [smem:[#allocation3 + $0xc]] }
  0x97   :  { %s895_s27 = sld [smem:[#allocation3 + $0x30]] }
  0x99   :  { %430 = vrot.lane.b32.xlu0 %v428_v20, %s997_s10  ;;  %70 = vrot.lane.b32.xlu1 %v68_v21, %s997_s10  ;;  %v127_v20 = vstv %s858_s9  ;;  %v488_v21 = vmul.f32 %v487_v19, %v1101_v62  ;;  %s936_s9 = sld [smem:[#allocation3 + $0x59]]  ;;  %v295_v5 = vstv %s883_s0  ;;  %s862_s0 = sld [smem:[#allocation3 + $0xf]] }
  0x9a   :  { %v128_v23 = vmul.f32 %v127_v20, %v1101_v62  ;;  %v407_v8 = vstv %s900_s6  ;;  %v175_v15 = vstv %s865_s8  ;;  %s898_s6 = sld [smem:[#allocation3 + $0x33]]  ;;  %s1000_s8 = smov 12  }
  0x9b   :  { %v176_v20 = vmul.f32 %v175_v15, %v1043_v7 }
  0x9d   :  { %82 = vrot.lane.b32.xlu0 %v80_v25, %s996_s5  ;;  %310 = vrot.lane.b32.xlu1 %v308_v26, %s997_s10  ;;  %v139_v25 = vstv %s860_s11  ;;  %v367_v26 = vstv %s894_s12  ;;  %s901_s11 = sld [smem:[#allocation3 + $0x36]]  ;;  %s868_s12 = sld [smem:[#allocation3 + $0x15]] }
  0x9e   :  { %v140_v27 = vmul.f32 %v139_v25, %v1125_v24  ;;  %v368_v28 = vmul.f32 %v367_v26, %v1101_v62 }
  0xa1   :  { %322 = vrot.lane.b32.xlu0 %v320_v29, %s996_s5  ;;  %550 = vrot.lane.b32.xlu1 %v548_v30, %s997_s10  ;;  %v379_v29 = vstv %s896_s13  ;;  %v607_v30 = vstv %s930_s14  ;;  %s904_s13 = sld [smem:[#allocation3 + $0x39]]  ;;  %s886_s14 = sld [smem:[#allocation3 + $0x27]] }
  0xa2   :  { %v380_v31 = vmul.f32 %v379_v29, %v1125_v24  ;;  %v608_v32 = vmul.f32 %v607_v30, %v1101_v62 }
  0xa3   :  { %v415_v26 = vstv %s901_s11  ;;  %v195_v29 = vstv %s868_s12  ;;  %s1003_s11 = smov 24   ;;  %s1004_s12 = smov 18  }
  0xa4   :  { %v416_v30 = vmul.f32 %v415_v26, %v1043_v7 }
  0xa5   :  { %562 = vrot.lane.b32.xlu0 %v560_v33, %s996_s5  ;;  %202 = vrot.lane.b32.xlu1 %v200_v34, %s996_s5  ;;  %v619_v33 = vstv %s932_s15  ;;  %v259_v34 = vstv %s878_s16  ;;  %s922_s15 = sld [smem:[#allocation3 + $0x4b]]  ;;  %s853_s16 = sld [smem:[#allocation3 + $0x6]] }
  0xa6   :  { %v620_v35 = vmul.f32 %v619_v33, %v1125_v24  ;;  %v260_v36 = vmul.f32 %v259_v34, %v1125_v24 }
  0xa9   :  { %210 = vrot.lane.b32.xlu0 %v208_v37, %s997_s10  ;;  %442 = vrot.lane.b32.xlu1 %v440_v38, %s996_s5  ;;  %v267_v37 = vstv %s879_s17  ;;  %v499_v38 = vstv %s914_s18  ;;  %s907_s17 = sld [smem:[#allocation3 + $0x3c]]  ;;  %s889_s18 = sld [smem:[#allocation3 + $0x2a]] }
  0xaa   :  { %v268_v39 = vmul.f32 %v267_v37, %v1125_v24  ;;  %v500_v40 = vmul.f32 %v499_v38, %v1125_v24  ;;  %v435_v37 = vstv %s904_s13 }
  0xad   :  { %450 = vrot.lane.b32.xlu0 %v448_v41, %s997_s10  ;;  %90 = vrot.lane.b32.xlu1 %v88_v42, %s997_s10  ;;  %v507_v41 = vstv %s915_s19  ;;  %v147_v42 = vstv %s861_s20  ;;  %s925_s19 = sld [smem:[#allocation3 + $0x4e]]  ;;  %s874_s20 = sld [smem:[#allocation3 + $0x1b]] }
  0xae   :  { %v508_v44 = vmul.f32 %v507_v41, %v1125_v24  ;;  %v148_v45 = vmul.f32 %v147_v42, %v1125_v24 }
  0xb1   :  { %102 = vrot.lane.b32.xlu0 %v100_v46, %s996_s5  ;;  %330 = vrot.lane.b32.xlu1 %v328_v47, %s997_s10  ;;  %v1147_v46 = vld [vmem:[#allocation2 + $0xa] sm:$0x3f]  ;;  %v159_v47 = vstv %s863_s21  ;;  %s856_s21 = sld [smem:[#allocation3 + $0x9]] }
  0xb2   :  { %v160_v49 = vmul.f32 %v159_v47, %v1147_v46  ;;  %v520_v63 = vmul.f32 %v519_v60, %v1147_v46  ;;  %v315_v47 = vstv %s886_s14 }
  0xb5   :  { %342 = vrot.lane.b32.xlu0 %v340_v50, %s996_s5  ;;  %570 = vrot.lane.b32.xlu1 %v568_v51, %s997_s10  ;;  %v388_v50 = vmul.f32 %v387_v48, %v1125_v24  ;;  %v399_v51 = vstv %s899_s1  ;;  %s892_s1 = sld [smem:[#allocation3 + $0x2d]] }
  0xb6   :  { %v400_v53 = vmul.f32 %v399_v51, %v1147_v46 }
  0xb9   :  { %582 = vrot.lane.b32.xlu0 %v580_v54, %s996_s5  ;;  %222 = vrot.lane.b32.xlu1 %v220_v55, %s996_s5  ;;  %v628_v54 = vmul.f32 %v627_v52, %v1125_v24  ;;  %v639_v55 = vstv %s935_s24  ;;  %s877_s24 = sld [smem:[#allocation3 + $0x1e]] }
  0xba   :  { %v640_v57 = vmul.f32 %v639_v55, %v1147_v46 }
  0xbd   :  { %230 = vrot.lane.b32.xlu0 %v228_v58, %s997_s10  ;;  %462 = vrot.lane.b32.xlu1 %v460_v59, %s996_s5  ;;  %v280_v58 = vmul.f32 %v279_v56, %v1147_v46  ;;  %v287_v59 = vstv %s882_s26  ;;  %s913_s26 = sld [smem:[#allocation3 + $0x42]] }
  0xbe   :  { %v288_v61 = vmul.f32 %v287_v59, %v1147_v46 }
  0xc1   :  { %470 = vrot.lane.b32.xlu0 %v468_v0, %s997_s10  ;;  %110 = vrot.lane.b32.xlu1 %v108_v1, %s997_s10  ;;  %v527_v0 = vstv %s918_s28  ;;  %v167_v1 = vstv %s864_s29  ;;  %s931_s28 = sld [smem:[#allocation3 + $0x54]]  ;;  %s880_s29 = sld [smem:[#allocation3 + $0x21]] }
  0xc2   :  { %v528_v3 = vmul.f32 %v527_v0, %v1147_v46 }
  0xc5   :  { %122 = vrot.lane.b32.xlu0 %v120_v4, %s996_s5  ;;  %350 = vrot.lane.b32.xlu1 %v348_v6, %s997_s10  ;;  %v168_v4 = vmul.f32 %v167_v1, %v1147_v46  ;;  %v55_v6 = vstv %s54_s30  ;;  %s916_s30 = sld [smem:[#allocation3 + $0x45]] }
  0xc6   :  { %v56_v10 = vmul.f32 %v55_v6, %v1043_v7 }
  0xc9   :  { %362 = vrot.lane.b32.xlu0 %v360_v9, %s996_s5  ;;  %590 = vrot.lane.b32.xlu1 %v588_v12, %s997_s10  ;;  %v296_v9 = vmul.f32 %v295_v5, %v1043_v7 }
  0xcd   :  { %602 = vrot.lane.b32.xlu0 %v600_v13, %s996_s5  ;;  %242 = vrot.lane.b32.xlu1 %v240_v14, %s996_s5  ;;  %v408_v13 = vmul.f32 %v407_v8, %v1147_v46  ;;  %v535_v14 = vstv %s919_s7  ;;  %s934_s7 = sld [smem:[#allocation3 + $0x57]] }
  0xce   :  { %v536_v19 = vmul.f32 %v535_v14, %v1043_v7 }
  0xd1   :  { %250 = vrot.lane.b32.xlu0 %v248_v17, %s997_s10  ;;  %482 = vrot.lane.b32.xlu1 %v480_v18, %s996_s5  ;;  %v647_v18 = vstv %s936_s9  ;;  %s1001_s9 = smov 6  }
  0xd2   :  { %v648_v25 = vmul.f32 %v647_v18, %v1147_v46  ;;  %v335_v18 = vstv %s889_s18 }
  0xd3   :  { %v336_v26 = vmul.f32 %v335_v18, %v1081_v43 }
  0xd5   :  { %490 = vrot.lane.b32.xlu0 %v488_v21, %s997_s10  ;;  %130 = vrot.lane.b32.xlu1 %v128_v23, %s997_s10 }
  0xd9   :  { %142 = vrot.lane.b32.xlu0 %v140_v27, %s996_s5  ;;  %370 = vrot.lane.b32.xlu1 %v368_v28, %s997_s10 }
  0xdd   :  { %382 = vrot.lane.b32.xlu0 %v380_v31, %s996_s5  ;;  %610 = vrot.lane.b32.xlu1 %v608_v32, %s997_s10 }
  0xe1   :  { %622 = vrot.lane.b32.xlu0 %v620_v35, %s996_s5  ;;  %262 = vrot.lane.b32.xlu1 %v260_v36, %s996_s5  ;;  %v196_v35 = vmul.f32 %v195_v29, %v1059_v22 }
  0xe5   :  { %270 = vrot.lane.b32.xlu0 %v268_v39, %s997_s10  ;;  %502 = vrot.lane.b32.xlu1 %v500_v40, %s996_s5 }
  0xe9   :  { %510 = vrot.lane.b32.xlu0 %v508_v44, %s997_s10  ;;  %150 = vrot.lane.b32.xlu1 %v148_v45, %s997_s10  ;;  %v436_v45 = vmul.f32 %v435_v37, %v1059_v22  ;;  %v235_v37 = vstv %s874_s20 }
  0xed   :  { %162 = vrot.lane.b32.xlu0 %v160_v49, %s996_s5  ;;  %390 = vrot.lane.b32.xlu1 %v388_v50, %s997_s10 }
  0xf1   :  { %402 = vrot.lane.b32.xlu0 %v400_v53, %s996_s5  ;;  %630 = vrot.lane.b32.xlu1 %v628_v54, %s997_s10  ;;  %v316_v53 = vmul.f32 %v315_v47, %v1059_v22  ;;  %v555_v54 = vstv %s922_s15 }
  0xf2   :  { %v556_v60 = vmul.f32 %v555_v54, %v1059_v22  ;;  %v355_v54 = vstv %s892_s1 }
  0xf5   :  { %642 = vrot.lane.b32.xlu0 %v640_v57, %s996_s5  ;;  %282 = vrot.lane.b32.xlu1 %v280_v58, %s996_s5 }
  0xf9   :  { %290 = vrot.lane.b32.xlu0 %v288_v61, %s997_s10  ;;  %522 = vrot.lane.b32.xlu1 %v520_v63, %s996_s5  ;;  %s850_s5 = sld [smem:[#allocation3 + $0x3]] }
  0xfd   :  { %530 = vrot.lane.b32.xlu0 %v528_v3, %s997_s10  ;;  %170 = vrot.lane.b32.xlu1 %v168_v4, %s997_s10 }
  0xff   :  { %v303_v11 = vpop.permute.xlu0 %302  ;;  %v63_v12 = vpop.permute.xlu1 %62  ;;  %v75_v36 = vstv %s850_s5  ;;  %s1005_s5 = smov 30  }
 0x100   :  { %v305_v16 = vadd.f32 %v303_v11, %v296_v9  ;;  %v65_v17 = vadd.f32 %v63_v12, %v56_v10  ;;  %v76_v44 = vmul.f32 %v75_v36, %v1059_v22  ;;  %v95_v10 = vstv %s853_s16 }
 0x101   :  { %410 = vrot.lane.b32.xlu1 %v408_v13, %s997_s10  ;;  %v455_v11 = vstv %s907_s17 }
 0x103   :  { %v543_v21 = vpop.permute.xlu0 %542  ;;  %v183_v23 = vpop.permute.xlu1 %182 }
 0x104   :  { %v545_v27 = vadd.f32 %v543_v21, %v536_v19  ;;  %v185_v28 = vadd.f32 %v183_v23, %v176_v20 }
 0x105   :  { %650 = vrot.lane.b32.xlu1 %v648_v25, %s997_s10  ;;  %s871_s10 = sld [smem:[#allocation3 + $0x18]] }
 0x107   :  { %v191_v31 = vpop.permute.xlu0 %190  ;;  %v423_v32 = vpop.permute.xlu1 %422 }
 0x108   :  { %v193_v33 = vadd.f32 %v191_v31, %v185_v28  ;;  %v425_v34 = vadd.f32 %v423_v32, %v416_v30 }
 0x10a   :  { %v197_v38 = vadd.f32 %v196_v35, %v193_v33 }
 0x10b   :  { %v431_v39 = vpop.permute.xlu0 %430  ;;  %v71_v40 = vpop.permute.xlu1 %70  ;;  %v215_v3 = vstv %s871_s10 }
 0x10c   :  { %v433_v41 = vadd.f32 %v431_v39, %v425_v34  ;;  %v73_v42 = vadd.f32 %v71_v40, %v65_v17  ;;  %v216_v9 = vmul.f32 %v215_v3, %v1081_v43  ;;  %v456_v17 = vmul.f32 %v455_v11, %v1081_v43 }
 0x10d   :  { %v255_v11 = vstv %s877_s24 }
 0x10e   :  { %v77_v7 = vadd.f32 %v76_v44, %v73_v42  ;;  %v437_v48 = vadd.f32 %v436_v45, %v433_v41  ;;  %v236_v42 = vmul.f32 %v235_v37, %v1101_v62  ;;  %v115_v44 = vstv %s856_s21 }
 0x10f   :  { %v83_v49 = vpop.permute.xlu0 %82  ;;  %v311_v50 = vpop.permute.xlu1 %310  ;;  %v475_v45 = vstv %s910_s22 }
 0x110   :  { %v85_v51 = vadd.f32 %v83_v49, %v77_v7  ;;  %v313_v52 = vadd.f32 %v311_v50, %v305_v16  ;;  %v96_v16 = vmul.f32 %v95_v10, %v1081_v43 }
 0x112   :  { %v317_v55 = vadd.f32 %v316_v53, %v313_v52  ;;  %v116_v52 = vmul.f32 %v115_v44, %v1101_v62  ;;  %v476_v53 = vmul.f32 %v475_v45, %v1101_v62 }
 0x113   :  { %v323_v56 = vpop.permute.xlu0 %322  ;;  %v551_v57 = vpop.permute.xlu1 %550 }
 0x114   :  { %v325_v58 = vadd.f32 %v323_v56, %v317_v55  ;;  %v553_v59 = vadd.f32 %v551_v57, %v545_v27  ;;  %v575_v27 = vstv %s925_s19 }
 0x115   :  { %v576_v33 = vmul.f32 %v575_v27, %v1081_v43 }
 0x116   :  { %v557_v61 = vadd.f32 %v556_v60, %v553_v59 }
 0x117   :  { %v563_v63 = vpop.permute.xlu0 %562  ;;  %v203_v0 = vpop.permute.xlu1 %202 }
 0x118   :  { %v205_v1 = vadd.f32 %v203_v0, %v197_v38  ;;  %v565_v28 = vadd.f32 %v563_v63, %v557_v61  ;;  %v356_v61 = vmul.f32 %v355_v54, %v1101_v62  ;;  %v595_v63 = vstv %s928_s23 }
 0x11b   :  { %v211_v4 = vpop.permute.xlu0 %210  ;;  %v443_v5 = vpop.permute.xlu1 %442 }
 0x11c   :  { %v213_v6 = vadd.f32 %v211_v4, %v205_v1  ;;  %v445_v8 = vadd.f32 %v443_v5, %v437_v48 }
 0x11e   :  { %v217_v12 = vadd.f32 %v216_v9, %v213_v6  ;;  %v596_v6 = vmul.f32 %v595_v63, %v1101_v62  ;;  %v395_v63 = vstv %s898_s6 }
 0x11f   :  { %v451_v13 = vpop.permute.xlu0 %450  ;;  %v91_v22 = vpop.permute.xlu1 %90 }
 0x120   :  { %v453_v14 = vadd.f32 %v451_v13, %v445_v8  ;;  %v93_v15 = vadd.f32 %v91_v22, %v85_v51 }
 0x122   :  { %v97_v19 = vadd.f32 %v96_v16, %v93_v15  ;;  %v457_v20 = vadd.f32 %v456_v17, %v453_v14  ;;  %v256_v15 = vmul.f32 %v255_v11, %v1125_v24  ;;  %v135_v16 = vstv %s859_s25 }
 0x123   :  { %v103_v21 = vpop.permute.xlu0 %102  ;;  %v331_v23 = vpop.permute.xlu1 %330  ;;  %v495_v17 = vstv %s913_s26 }
 0x124   :  { %v333_v25 = vadd.f32 %v331_v23, %v325_v58  ;;  %v105_v47 = vadd.f32 %v103_v21, %v97_v19  ;;  %v496_v27 = vmul.f32 %v495_v17, %v1125_v24 }
 0x126   :  { %v337_v29 = vadd.f32 %v336_v26, %v333_v25  ;;  %v136_v26 = vmul.f32 %v135_v16, %v1125_v24 }
 0x127   :  { %v343_v30 = vpop.permute.xlu0 %342  ;;  %v571_v31 = vpop.permute.xlu1 %570 }
 0x128   :  { %v573_v32 = vadd.f32 %v571_v31, %v565_v28  ;;  %v345_v55 = vadd.f32 %v343_v30, %v337_v29  ;;  %v375_v28 = vstv %s895_s27 }
 0x12a   :  { %v577_v34 = vadd.f32 %v576_v33, %v573_v32 }
 0x12b   :  { %v583_v35 = vpop.permute.xlu0 %582  ;;  %v223_v36 = vpop.permute.xlu1 %222 }
 0x12c   :  { %v225_v38 = vadd.f32 %v223_v36, %v217_v12  ;;  %v585_v0 = vadd.f32 %v583_v35, %v577_v34  ;;  %v376_v35 = vmul.f32 %v375_v28, %v1125_v24  ;;  %v615_v36 = vstv %s931_s28 }
 0x12f   :  { %v231_v39 = vpop.permute.xlu0 %230  ;;  %v463_v40 = vpop.permute.xlu1 %462 }
 0x130   :  { %v233_v41 = vadd.f32 %v231_v39, %v225_v38  ;;  %v465_v7 = vadd.f32 %v463_v40, %v457_v20 }
 0x132   :  { %v237_v48 = vadd.f32 %v236_v42, %v233_v41  ;;  %v616_v42 = vmul.f32 %v615_v36, %v1125_v24 }
 0x133   :  { %v471_v43 = vpop.permute.xlu0 %470  ;;  %v111_v49 = vpop.permute.xlu1 %110 }
 0x134   :  { %v473_v50 = vadd.f32 %v471_v43, %v465_v7  ;;  %v113_v51 = vadd.f32 %v111_v49, %v105_v47  ;;  %v275_v7 = vstv %s880_s29 }
 0x136   :  { %v117_v56 = vadd.f32 %v116_v52, %v113_v51  ;;  %v477_v57 = vadd.f32 %v476_v53, %v473_v50  ;;  %v276_v51 = vmul.f32 %v275_v7, %v1147_v46  ;;  %v155_v52 = vstv %s862_s0 }
 0x137   :  { %v123_v58 = vpop.permute.xlu0 %122  ;;  %v351_v59 = vpop.permute.xlu1 %350  ;;  %v515_v53 = vstv %s916_s30  ;;  %v703_v7 = vcombine.high %v995_v2, %v995_v2 }
 0x138   :  { %v353_v60 = vadd.f32 %v351_v59, %v345_v55  ;;  %v125_v18 = vadd.f32 %v123_v58, %v117_v56 }
 0x13a   :  { %v357_v1 = vadd.f32 %v356_v61, %v353_v60  ;;  %v156_v60 = vmul.f32 %v155_v52, %v1147_v46  ;;  %v516_v61 = vmul.f32 %v515_v53, %v1147_v46 }
 0x13b   :  { %v363_v3 = vpop.permute.xlu0 %362  ;;  %v591_v4 = vpop.permute.xlu1 %590 }
 0x13c   :  { %v593_v5 = vadd.f32 %v591_v4, %v585_v0  ;;  %v365_v29 = vadd.f32 %v363_v3, %v357_v1 }
 0x13e   :  { %v597_v8 = vadd.f32 %v596_v6, %v593_v5 }
 0x13f   :  { %v603_v9 = vpop.permute.xlu0 %602  ;;  %v243_v10 = vpop.permute.xlu1 %242 }
 0x140   :  { %v245_v12 = vadd.f32 %v243_v10, %v237_v48  ;;  %v605_v37 = vadd.f32 %v603_v9, %v597_v8  ;;  %v396_v8 = vmul.f32 %v395_v63, %v1147_v46  ;;  %v635_v9 = vstv %s934_s7 }
 0x143   :  { %v251_v13 = vpop.permute.xlu0 %250  ;;  %v483_v22 = vpop.permute.xlu1 %482 }
 0x144   :  { %v253_v14 = vadd.f32 %v251_v13, %v245_v12  ;;  %v485_v19 = vadd.f32 %v483_v22, %v477_v57 }
 0x146   :  { %v257_v20 = vadd.f32 %v256_v15, %v253_v14  ;;  %v636_v14 = vmul.f32 %v635_v9, %v1147_v46 }
 0x147   :  { %v491_v62 = vpop.permute.xlu0 %490  ;;  %v131_v21 = vpop.permute.xlu1 %130 }
 0x148   :  { %v493_v23 = vadd.f32 %v491_v62, %v485_v19  ;;  %v133_v25 = vadd.f32 %v131_v21, %v125_v18  ;;  %v659_v21 = vlaneseq }
 0x14a   :  { %v137_v30 = vadd.f32 %v136_v26, %v133_v25  ;;  %v497_v31 = vadd.f32 %v496_v27, %v493_v23  ;;  %v660_v27 = vshrl.u32 %v659_v21, 7 }
 0x14b   :  { %v143_v32 = vpop.permute.xlu0 %142  ;;  %v371_v33 = vpop.permute.xlu1 %370 }
 0x14c   :  { %v373_v34 = vadd.f32 %v371_v33, %v365_v29  ;;  %v145_v54 = vadd.f32 %v143_v32, %v137_v30 }
 0x14e   :  { %v377_v38 = vadd.f32 %v376_v35, %v373_v34 }
 0x14f   :  { %v383_v39 = vpop.permute.xlu0 %382  ;;  %v611_v40 = vpop.permute.xlu1 %610 }
 0x150   :  { %v613_v41 = vadd.f32 %v611_v40, %v605_v37  ;;  %v385_v0 = vadd.f32 %v383_v39, %v377_v38  ;;  %v999_v37 = vmov 1934713408  }
 0x151   :  { %v721_v38 = vunpack.c.l.s4 %v999_v37 }
 0x152   :  { %v617_v44 = vadd.f32 %v616_v42, %v613_v41  ;;  %v702_v41 = vcombine.low %v995_v2, %v995_v2 }
 0x153   :  { %v623_v45 = vpop.permute.xlu0 %622  ;;  %v263_v47 = vpop.permute.xlu1 %262 }
 0x154   :  { %v265_v48 = vadd.f32 %v263_v47, %v257_v20  ;;  %v625_v10 = vadd.f32 %v623_v45, %v617_v44  ;;  %v998_v20 = vmov 1983009808  }
 0x155   :  { %v657_v62 = vunpack.c.l.s4 %v998_v20 }
 0x157   :  { %v271_v43 = vpop.permute.xlu0 %270  ;;  %v503_v49 = vpop.permute.xlu1 %502  ;;  %v658_v26 = vunpack.c.0.s8 %v657_v62 }
 0x158   :  { %v273_v50 = vadd.f32 %v271_v43, %v265_v48  ;;  %v505_v55 = vadd.f32 %v503_v49, %v497_v31  ;;  %v722_v43 = vunpack.c.0.s8 %v721_v38 }
 0x159   :  { %v661_v35 = vsub.s32 %v658_v26, %v660_v27 }
 0x15a   :  { %v277_v56 = vadd.f32 %v276_v51, %v273_v50 }
 0x15b   :  { %v511_v24 = vpop.permute.xlu0 %510  ;;  %v151_v57 = vpop.permute.xlu1 %150  ;;  %v710_v53 = vrot.slane %v702_v41, %v661_v35 }
 0x15c   :  { %v513_v58 = vadd.f32 %v511_v24, %v505_v55  ;;  %v153_v59 = vadd.f32 %v151_v57, %v145_v54  ;;  %v717_v57 = vrot.slane %v703_v7, %v661_v35 }
 0x15e   :  { %v157_v1 = vadd.f32 %v156_v60, %v153_v59  ;;  %v517_v3 = vadd.f32 %v516_v61, %v513_v58  ;;  %v725_v60 = vsub.s32 %v722_v43, %v660_v27 }
 0x15f   :  { %v163_v4 = vpop.permute.xlu0 %162  ;;  %v391_v5 = vpop.permute.xlu1 %390 }
 0x160   :  { %v393_v6 = vadd.f32 %v391_v5, %v385_v0  ;;  %v165_v32 = vadd.f32 %v163_v4, %v157_v1 }
 0x162   :  { %v397_v11 = vadd.f32 %v396_v8, %v393_v6 }
 0x163   :  { %v403_v12 = vpop.permute.xlu0 %402  ;;  %v631_v13 = vpop.permute.xlu1 %630 }
 0x164   :  { %v633_v22 = vadd.f32 %v631_v13, %v625_v10  ;;  %v405_v33 = vadd.f32 %v403_v12, %v397_v11 }
 0x166   :  { %v637_v15 = vadd.f32 %v636_v14, %v633_v22 }
 0x167   :  { %v643_v16 = vpop.permute.xlu0 %642  ;;  %v283_v17 = vpop.permute.xlu1 %282 }
 0x168   :  { %v285_v23 = vadd.f32 %v283_v17, %v277_v56  ;;  %v645_v42 = vadd.f32 %v643_v16, %v637_v15 }
 0x16b   :  { %v291_v18 = vpop.permute.xlu0 %290  ;;  %v523_v19 = vpop.permute.xlu1 %522 }
 0x16c   :  { %v525_v25 = vadd.f32 %v523_v19, %v517_v3  ;;  %v293_v30 = vadd.f32 %v291_v18, %v285_v23 }
 0x16f   :  { %v531_v28 = vpop.permute.xlu0 %530  ;;  %v171_v29 = vpop.permute.xlu1 %170 }
 0x170   :  { %v533_v31 = vadd.f32 %v531_v28, %v525_v25  ;;  %v173_v39 = vadd.f32 %v171_v29, %v165_v32  ;;  %v825_v29 = vld [vmem:[%s1235_s3] sm:$0xff]  ;;  %s1006_s3 = smov [#allocation6]  }
 0x171   :  { %s839_s16 = sshll.u32 %s1006_s3, 4  ;;  %s840_s16 = int_to_ptr.vmem [resolvable:$true] %s839_s16 }
 0x172   :  { %v670_v34 = vcombine.low %v293_v30, %v533_v31  ;;  %v671_v46 = vcombine.high %v293_v30, %v533_v31  ;;  %v818_v30 = vld [vmem:[%s1234_s2] sm:$0xff]  ;;  %s967_s2 = scalar_lea.vmem %s840_s16, 128  ;;  %p972_p6 = scmp.lt.s32.totalorder %s840_s16, %s840_s16 }
 0x173   :  { %v411_v36 = vpop.permute.xlu1 %410  ;;  %p968_p5 = scmp.ne.s32.totalorder %s840_s16, %s967_s2  ;;  %p973_p7 = scmp.lt.s32.totalorder %s967_s2, %s967_s2 }
 0x174   :  { %v413_v40 = vadd.f32 %v411_v36, %v405_v33  ;;  %v678_v47 = vrot.slane %v670_v34, %v661_v35  ;;  %v685_v49 = vrot.slane %v671_v46, %v661_v35 }
 0x175   :  { %p974_p8 = por %p973_p7, %p972_p6 }
 0x176   :  { %v654_v44 = vcombine.low %v173_v39, %v413_v40  ;;  %v655_v45 = vcombine.high %v173_v39, %v413_v40 }
 0x177   :  { %v651_v48 = vpop.permute.xlu1 %650  ;;  %p975_p9 = pnand %p974_p8, %p968_p5 }
 0x178   :  { %v662_v50 = vrot.slane %v654_v44, %v661_v35  ;;  %v669_v51 = vrot.slane %v655_v45, %v661_v35  ;;  %v653_v52 = vadd.f32 %v651_v48, %v645_v42 }
 0x17a   :  { %v718_v54 = vcombine.low %v662_v50, %v678_v47  ;;  %v719_v55 = vcombine.high %v662_v50, %v678_v47  ;;  %v734_v56 = vcombine.low %v669_v51, %v685_v49  ;;  %v686_v24 = vcombine.low %v653_v52, %v995_v2 }
 0x17b   :  { %v687_v58 = vcombine.high %v653_v52, %v995_v2  ;;  %v1002_v2 = vmov 0  }
 0x17c   :  { %v694_v59 = vrot.slane %v686_v24, %v661_v35  ;;  %v733_v3 = vrot.slane %v719_v55, %v725_v60  ;;  %v726_v5 = vrot.slane %v718_v54, %v725_v60  ;;  %v741_v8 = vrot.slane %v734_v56, %v725_v60  ;;  %951 = vset.pattern.permute.xlu0 %v1002_v2 }
 0x17d   :  { %v701_v61 = vrot.slane %v687_v58, %v661_v35  ;;  %952 = vset.pattern.permute.xlu1 %v1002_v2 }
 0x17e   :  { %v742_v63 = vcombine.low %v694_v59, %v710_v53  ;;  %v743_v0 = vcombine.high %v694_v59, %v710_v53 }
 0x17f   :  { %v758_v1 = vcombine.low %v701_v61, %v717_v57 }
 0x180   :  { %v757_v4 = vrot.slane %v743_v0, %v725_v60  ;;  %v750_v6 = vrot.slane %v742_v63, %v725_v60 }
 0x181   :  { %v765_v9 = vrot.slane %v758_v1, %v725_v60 }
 0x182   :  { %v768_v10 = vcombine.low %v733_v3, %v757_v4  ;;  %v767_v11 = vcombine.high %v726_v5, %v750_v6  ;;  %v769_v12 = vcombine.high %v733_v3, %v757_v4  ;;  %v766_v13 = vcombine.low %v726_v5, %v750_v6 }
 0x183   :  { %v770_v22 = vcombine.low %v741_v8, %v765_v9  ;;  %v771_v14 = vcombine.high %v741_v8, %v765_v9 }
 0x184   :  { %777 = vrot.lane.b32.xlu1 %v768_v10, %s1000_s8  ;;  %773 = vrot.lane.b32.xlu0 %v767_v11, %s1001_s9 }
 0x188   :  { %785 = vrot.lane.b32.xlu1 %v770_v22, %s1003_s11  ;;  %781 = vrot.lane.b32.xlu0 %v769_v12, %s1004_s12 }
 0x18c   :  { %789 = vrot.lane.b32.xlu0 %v771_v14, %s1005_s5 }
 0x1f6   :  { %v778_v15 = vpop.permute.xlu1 %777  ;;  %v774_v16 = vpop.permute.xlu0 %773 }
 0x1f7   :  { %v793_v17 = vsel %vm792_vm2, %v766_v13, %v774_v16 }
 0x1f8   :  { %v795_v19 = vsel %vm794_vm3, %v793_v17, %v778_v15 }
 0x1fa   :  { %v782_v18 = vpop.permute.xlu0 %781  ;;  %v786_v20 = vpop.permute.xlu1 %785 }
 0x1fb   :  { %v797_v62 = vsel %vm796_vm4, %v795_v19, %v782_v18 }
 0x1fc   :  { %v799_v23 = vsel %vm798_vm5, %v797_v62, %v786_v20 }
 0x1fe   :  { %v790_v21 = vpop.permute.xlu0 %789 }
 0x1ff   :  { %v801_v25 = vsel %vm800_vm6, %v799_v23, %v790_v21 }
 0x200   :  { %v803_v26 = vsel %vm802_vm7, %v801_v25, 0.0  ;;  %v806_v27 = vmul.f32 %v801_v25, %v801_v25 }
 0x201   :  { %804 = vadd.xlane.f32.xlu1 %v803_v26 }
 0x202   :  { %v807_v28 = vsel %vm802_vm7, %v806_v27, 0.0 }
 0x203   :  { %808 = vadd.xlane.f32.xlu0 %v807_v28 }
 0x212   :  { %828 = vperm.xlu1 %952, %v825_v29  }
 0x219   :  { %821 = vperm.xlu0 %951, %v818_v30  }
 0x28e   :  { %v805_v31 = vpop.xlane.xlu1 %804 }
 0x28f   :  { %v810_v32 = vmul.f32 0.027777778, %v805_v31 }
 0x290   :  { %v809_v33 = vpop.xlane.xlu0 %808 }
 0x291   :  { %v812_v34 = vmul.f32 %v810_v32, %v810_v32  ;;  %v811_v46 = vmul.f32 0.027777778, %v809_v33  ;;  %v814_v37 = vsub.f32 %v801_v25, %v810_v32 }
 0x292   :  { %v829_v41 = vpop.permute.xlu1 %828 }
 0x293   :  { %v813_v35 = vsub.f32 %v811_v46, %v812_v34 }
 0x295   :  { %v815_v36 = vadd.f32 1e-05, %v813_v35 }
 0x297   :  { %953 = vrsqrt.f32 %v815_v36 }
 0x298   :  { %v822_v39 = vpop.permute.xlu0 %821 }
 0x2a1   :  { %v954_v38 = vpop.eup %953 }
 0x2a2   :  { %v817_v40 = vmul.f32 %v954_v38, %v814_v37 }
 0x2a4   :  { %v824_v42 = vmul.f32 %v822_v39, %v817_v40 }
 0x2a6   :  { %v831_v44 = vadd.f32 %v829_v41, %v824_v42 }
 0x2a8   :  { %832 = vst.msk [vmem:[#allocation6] sm:$0xff] %vm802_vm7, %v831_v44 }
 0x2a9   :  { %978 = shalt.err (!%p975_p9)
}
 0x2aa   :  { %s979_s19 = scalar_lea.hbm %s1236_s4, 128 }
 0x2ab   :  { %p980_p10 = scmp.ne.s32.totalorder %s1236_s4, %s979_s19  ;;  %p983_p11 = scmp.lt.u32.totalorder %s979_s19, %s1236_s4 }
 0x2ad   :  { %p985_p12 = pnand %p983_p11, %p980_p10 }
 0x2af   :  { %988 = shalt.err (!%p985_p12)
}
 0x2b0   :  { %842 = dma.vmem_to_hbm [thread:$0]  %s840_s16, 128, %s1236_s4, [#allocation4]  }
 0x2b1   :  { %991 = dma.done.wait [#allocation4], 128  }
 0x2b2   :  { %992 = vsyncadd [#allocation4], 4294967168 }
 0x2b3   :  { %846 = vsyncpa [#allocation4], 1 }
 0x2b4   :  { %847 = vsyncpa [#allocation5], 1 }

</bundles_post_ra>
